<compile_context>
chip_gen: v6e
topology: v6e:2x2x1
jax: 0.10.0
libtpu: 0.0.40
codegen_flags: <defaults>
</compile_context>

<pallas_src>
import math
import functools

import jax
import jax.numpy as jnp
from jax.experimental import pallas as pl
from jax.experimental.pallas import tpu as pltpu


def _round_up(x, m):
    return (x + m - 1) // m * m


def _cdiv(a, b):
    return -(-a // b)


def _conv_tap_kernel(x_ref, w_ref, b_ref, o_ref, *,
                     KH, KW, sh, sw, dh, dw, toh, owp, cin_g):
    """One grid step = one (batch, group, row-block, cout-tile) output block.

    x_ref : (rows, wq, sw*cin_g)   input window (W stride folded into lanes)
    w_ref : (KH, KW, cin_g, cout_t)
    b_ref : (1, cout_t)            bias (fp32)
    o_ref : (toh, owp, cout_t)
    """
    mt = toh * owp
    nc = o_ref.shape[-1]
    # Initialise the accumulator with the bias -> no separate bias-add pass.
    acc = jnp.broadcast_to(b_ref[...].astype(jnp.float32), (mt, nc))
    for kh in range(KH):                       # static loop over kernel taps
        if sh > 1:
            hsl = pl.ds(kh * dh, toh, stride=sh)
        else:
            hsl = pl.ds(kh * dh, toh)
        for kw in range(KW):
            q0 = (kw * dw) // sw               # W-block offset for this tap
            wr = (kw * dw) % sw                # W stride phase for this tap
            if sw > 1:
                csl = pl.ds(wr * cin_g, cin_g)
            else:
                csl = slice(None)
            a = x_ref[hsl, pl.ds(q0, owp), csl]            # (toh, owp, cin_g)
            acc = acc + jnp.dot(a.reshape(mt, cin_g), w_ref[kh, kw],
                                preferred_element_type=jnp.float32)
    o_ref[...] = acc.reshape(toh, owp, nc).astype(o_ref.dtype)


def conv2d_pallas(x, weight, bias, *, stride=(1, 1), padding=(0, 0),
                  dilation=(1, 1), groups=1, compute_dtype=None):
    """F.conv2d equivalent.  x: (N, Cin, H, W); weight: (Cout, Cin//g, KH, KW);
    bias: (Cout,).  Returns (N, Cout, OH, OW)."""
    N, Cin, H, W = x.shape
    Cout, cin_g, KH, KW = weight.shape
    assert Cin == cin_g * groups and Cout % groups == 0
    cout_g = Cout // groups
    sh, sw = stride
    ph, pw = padding
    dh, dw = dilation

    OH = (H + 2 * ph - dh * (KH - 1) - 1) // sh + 1
    OW = (W + 2 * pw - dw * (KW - 1) - 1) // sw + 1
    assert OH > 0 and OW > 0

    cdt = jnp.dtype(compute_dtype) if compute_dtype is not None else jnp.dtype(x.dtype)
    out_dtype = x.dtype
    dt_bytes = cdt.itemsize

    owp = _round_up(OW, 8)                     # sublane-aligned output width
    lane_c = sw * cin_g                        # W stride phases folded into lanes
    wq = ((KW - 1) * dw) // sw + owp           # W positions per row block
    w_total = wq * sw                          # padded input width

    # ---- cout tiling: use the exact cout_g as a single tile when small ------
    if cout_g <= 512:
        cout_t, cout_gp = cout_g, cout_g
    else:
        cout_gp = _round_up(cout_g, 128)
        cout_t = 128
        for cand in (512, 256):
            if cout_gp % cand == 0 and KH * KW * cin_g * cand * dt_bytes <= 8 * 2 ** 20:
                cout_t = cand
                break
    nct = cout_gp // cout_t
    # TODO(synk): for many small groups (cout_g << 128), folding groups into one
    # lane-dense N tile (block-diagonal weights) would further cut output waste.

    # ---- output-row block size (bounds the VMEM working set) ----------------
    bytes_per_in_row = wq * lane_c * dt_bytes
    budget_rows = max((KH - 1) * dh + 1, (4 * 2 ** 20) // max(1, bytes_per_in_row))
    toh_cap = max(1, (budget_rows - (KH - 1) * dh - 1) // sh + 1)
    toh_cap = min(OH, toh_cap, max(1, 2048 // owp))
    ob = max(1, _cdiv(OH, toh_cap))
    if N * groups * nct == 1 and ob == 1 and OH > 1:
        ob = 2                                 # keep both v7x TensorCores busy
    toh = _cdiv(OH, ob)                        # even split: < ob rows of waste
    rows = (toh - 1) * sh + (KH - 1) * dh + 1  # input rows per block (with halo)

    # ---- input: NCHW -> padded NHWC, group split, W-phase fold, row blocks --
    h_need = (ob * toh - 1) * sh + (KH - 1) * dh + 1
    xt = jnp.transpose(x, (0, 2, 3, 1))                              # (N,H,W,Cin)
    xt = jnp.pad(xt, ((0, 0),
                      (ph, max(0, h_need - H - ph)),
                      (pw, max(0, w_total - W - pw)),
                      (0, 0)))
    xt = xt[:, :h_need, :w_total, :]
    xt = xt.reshape(N, h_need, wq, sw, groups, cin_g)
    xt = jnp.transpose(xt, (0, 4, 1, 2, 3, 5))                       # (N,g,h,wq,sw,ci)
    xt = xt.reshape(N, groups, h_need, wq, lane_c).astype(cdt)
    if ob == 1:
        x_blk = xt[:, :, None]                                       # (N,g,1,rows,wq,lane)
    else:
        ridx = (jnp.arange(ob) * (toh * sh))[:, None] + jnp.arange(rows)[None, :]
        x_blk = xt[:, :, ridx]                                       # (N,g,ob,rows,wq,lane)

    # ---- weight / bias layout ------------------------------------------------
    wgt = weight.reshape(groups, cout_g, cin_g, KH, KW)
    wgt = jnp.transpose(wgt, (0, 3, 4, 2, 1))                        # (g,KH,KW,ci,co)
    b = bias.reshape(groups, 1, cout_g).astype(jnp.float32)
    if cout_gp != cout_g:
        wgt = jnp.pad(wgt, ((0, 0),) * 4 + ((0, cout_gp - cout_g),))
        b = jnp.pad(b, ((0, 0), (0, 0), (0, cout_gp - cout_g)))
    wgt = wgt.astype(cdt)

    # ---- cost / VMEM bookkeeping ---------------------------------------------
    x_block_b = rows * wq * lane_c * dt_bytes
    w_block_b = KH * KW * cin_g * cout_t * dt_bytes
    o_block_b = toh * owp * cout_t * jnp.dtype(out_dtype).itemsize
    acc_b = toh * owp * cout_t * 4
    vmem_est = 2 * (x_block_b + w_block_b + o_block_b) + acc_b + (1 << 20)
    vmem_limit = int(min(48 * 2 ** 20, max(32 * 2 ** 20, 2 * vmem_est)))

    flops = 2 * N * ob * toh * owp * KH * KW * cin_g * groups * cout_gp
    bytes_accessed = (x_blk.size * dt_bytes * nct            # x re-read per cout tile
                      + wgt.size * dt_bytes * N * ob         # w re-read per M block
                      + b.size * 4 * N * ob
                      + N * groups * ob * toh * owp * cout_gp
                      * jnp.dtype(out_dtype).itemsize)

    kernel = functools.partial(
        _conv_tap_kernel, KH=KH, KW=KW, sh=sh, sw=sw, dh=dh, dw=dw,
        toh=toh, owp=owp, cin_g=cin_g)

    out = pl.pallas_call(
        kernel,
        out_shape=jax.ShapeDtypeStruct((N, groups, ob, toh, owp, cout_gp), out_dtype),
        grid=(N, groups, ob, nct),
        in_specs=[
            pl.BlockSpec((None, None, None, rows, wq, lane_c),
                         lambda n, g, o, j: (n, g, o, 0, 0, 0)),
            pl.BlockSpec((None, KH, KW, cin_g, cout_t),
                         lambda n, g, o, j: (g, 0, 0, 0, j)),
            pl.BlockSpec((None, 1, cout_t),
                         lambda n, g, o, j: (g, 0, j)),
        ],
        out_specs=pl.BlockSpec((None, None, None, toh, owp, cout_t),
                               lambda n, g, o, j: (n, g, o, 0, 0, j)),
        compiler_params=pltpu.CompilerParams(
            dimension_semantics=("parallel", "parallel", "parallel", "parallel"),
            vmem_limit_bytes=vmem_limit),
        cost_estimate=pl.CostEstimate(flops=int(flops), transcendentals=0,
                                      bytes_accessed=int(bytes_accessed)),
    )(x_blk, wgt, b)

    # ---- un-block, drop padding, back to NCHW --------------------------------
    out = out.reshape(N, groups, ob * toh, owp, cout_gp)
    out = out[:, :, :OH, :OW, :cout_g]
    out = jnp.transpose(out, (0, 1, 4, 2, 3))                        # (N,g,co,OH,OW)
    return out.reshape(N, Cout, OH, OW)


class Conv2dLayer:
    """JAX/Pallas counterpart of the PyTorch Conv2dLayer (deterministic init)."""

    def __init__(self, in_channels, out_channels, kernel_size,
                 stride=1, padding=0, dilation=1, groups=1, key=None,
                 compute_dtype=None):
        self.stride = (stride, stride) if isinstance(stride, int) else tuple(stride)
        self.padding = (padding, padding) if isinstance(padding, int) else tuple(padding)
        self.dilation = (dilation, dilation) if isinstance(dilation, int) else tuple(dilation)
        self.groups = groups
        self.compute_dtype = compute_dtype
        KH, KW = kernel_size
        cin_g = in_channels // groups
        fan_in = cin_g * KH * KW
        # kaiming_uniform_(a=sqrt(5)) => U(-1/sqrt(fan_in), 1/sqrt(fan_in)); bias: same bound.
        bound = 1.0 / math.sqrt(fan_in)
        kw_, kb_ = jax.random.split(key if key is not None else jax.random.PRNGKey(0))
        self.weight = jax.random.uniform(
            kw_, (out_channels, cin_g, KH, KW), jnp.float32, -bound, bound)
        self.bias = jax.random.uniform(kb_, (out_channels,), jnp.float32, -bound, bound)

    def __call__(self, x, parameter_name_to_parameter=None):
        if parameter_name_to_parameter is not None:
            weight = parameter_name_to_parameter['weight']
            bias = parameter_name_to_parameter['bias']
        else:
            weight, bias = self.weight, self.bias
        return conv2d_pallas(x, weight, bias, stride=self.stride,
                             padding=self.padding, dilation=self.dilation,
                             groups=self.groups, compute_dtype=self.compute_dtype)


def _reference(x, layer):
    return jax.lax.conv_general_dilated(
        x, layer.weight, window_strides=layer.stride,
        padding=[(layer.padding[0], layer.padding[0]),
                 (layer.padding[1], layer.padding[1])],
        rhs_dilation=layer.dilation,
        dimension_numbers=("NCHW", "OIHW", "NCHW"),
        feature_group_count=layer.groups,
        precision=jax.lax.Precision.HIGHEST,
    ) + layer.bias.reshape(1, -1, 1, 1)


if __name__ == "__main__":
    key = jax.random.PRNGKey(0)
    k_x, k_p, k_x2, k_p2 = jax.random.split(key, 4)

    # Test 1: batch=2, Cin=4, Cout=8, spatial 16x16, 3x3 conv, pad=1, stride=1.
    N, Cin, H, W = 2, 4, 16, 16
    Cout, KH, KW = 8, 3, 3
    x = jax.random.normal(k_x, (N, Cin, H, W), jnp.float32)
    layer = Conv2dLayer(Cin, Cout, (KH, KW), stride=1, padding=1,
                        dilation=1, groups=1, key=k_p)
    out = jax.block_until_ready(layer(x))
    ref = _reference(x, layer)
    assert out.shape == (N, Cout, H, W), out.shape
    assert jnp.allclose(out, ref, atol=1e-4, rtol=1e-4), float(jnp.max(jnp.abs(out - ref)))

    # Test 2: grouped / strided / dilated path.
    x2 = jax.random.normal(k_x2, (2, 4, 16, 16), jnp.float32)
    layer2 = Conv2dLayer(4, 8, (3, 3), stride=2, padding=2,
                         dilation=2, groups=2, key=k_p2)
    out2 = jax.block_until_ready(layer2(x2))
    ref2 = _reference(x2, layer2)
    assert out2.shape == ref2.shape, (out2.shape, ref2.shape)
    assert jnp.allclose(out2, ref2, atol=1e-4, rtol=1e-4), float(jnp.max(jnp.abs(out2 - ref2)))

    print("KERNEL_OK")
</pallas_src>

<mosaic_0001>
module attributes {stable_mosaic.version = 11 : i64} {
  func.func @_conv_tap_kernel(%arg0: i32, %arg1: i32, %arg2: i32, %arg3: i32, %arg4: memref<1x1x1x18x18x4xf32, #tpu.memory_space<vmem>>, %arg5: memref<1x3x3x4x8xf32, #tpu.memory_space<vmem>>, %arg6: memref<1x1x8xf32, #tpu.memory_space<vmem>>, %arg7: memref<1x1x1x16x16x8xf32, #tpu.memory_space<vmem>>) attributes {dimension_semantics = [#tpu.dimension_semantics<parallel>, #tpu.dimension_semantics<parallel>, #tpu.dimension_semantics<parallel>, #tpu.dimension_semantics<parallel>], iteration_bounds = array<i64: 2, 1, 1, 1>, scalar_prefetch = 0 : i64, scratch_operands = 0 : i64, tpu.core_type = #tpu.core_type<tc>, window_params = [{transform_indices = @transform_0, window_bounds = array<i64: 1, 1, 1, 18, 18, 4>}, {transform_indices = @transform_1, window_bounds = array<i64: 1, 3, 3, 4, 8>}, {transform_indices = @transform_2, window_bounds = array<i64: 1, 1, 8>}, {transform_indices = @transform_3, window_bounds = array<i64: 1, 1, 1, 16, 16, 8>}]} {
    %c0 = arith.constant 0 : index
    %c0_0 = arith.constant 0 : index
    %c0_1 = arith.constant 0 : index
    %0 = vector.load %arg6[%c0, %c0_0, %c0_1] : memref<1x1x8xf32, #tpu.memory_space<vmem>>, vector<1x1x8xf32>
    %1 = vector.shape_cast %0 : vector<1x1x8xf32> to vector<1x8xf32>
    %2 = vector.shape_cast %1 : vector<1x8xf32> to vector<1x8xf32>
    %3 = vector.broadcast %2 : vector<1x8xf32> to vector<256x8xf32>
    %c0_2 = arith.constant 0 : index
    %c0_3 = arith.constant 0 : index
    %c0_4 = arith.constant 0 : index
    %c0_5 = arith.constant 0 : index
    %c0_6 = arith.constant 0 : index
    %c0_7 = arith.constant 0 : index
    %4 = vector.load %arg4[%c0_2, %c0_3, %c0_4, %c0_5, %c0_6, %c0_7] : memref<1x1x1x18x18x4xf32, #tpu.memory_space<vmem>>, vector<1x1x1x16x16x4xf32>
    %5 = vector.shape_cast %4 : vector<1x1x1x16x16x4xf32> to vector<16x16x4xf32>
    %6 = vector.shape_cast %5 : vector<16x16x4xf32> to vector<256x4xf32>
    %c0_8 = arith.constant 0 : index
    %c0_9 = arith.constant 0 : index
    %c0_10 = arith.constant 0 : index
    %c0_11 = arith.constant 0 : index
    %c0_12 = arith.constant 0 : index
    %7 = vector.load %arg5[%c0_8, %c0_9, %c0_10, %c0_11, %c0_12] : memref<1x3x3x4x8xf32, #tpu.memory_space<vmem>>, vector<1x1x1x4x8xf32>
    %8 = vector.shape_cast %7 : vector<1x1x1x4x8xf32> to vector<4x8xf32>
    %cst = arith.constant dense<0.000000e+00> : vector<256x8xf32>
    %9 = tpu.matmul %6, %8, %cst {dimension_numbers = #tpu.dot_dimension_numbers<[1], [0], [0], [1], [0, 0, 1, 1], [], []>} : vector<256x4xf32>, vector<4x8xf32>, vector<256x8xf32> -> vector<256x8xf32>
    %10 = arith.addf %3, %9 : vector<256x8xf32>
    %c0_13 = arith.constant 0 : index
    %c0_14 = arith.constant 0 : index
    %c0_15 = arith.constant 0 : index
    %c0_16 = arith.constant 0 : index
    %c1 = arith.constant 1 : index
    %c0_17 = arith.constant 0 : index
    %11 = vector.load %arg4[%c0_13, %c0_14, %c0_15, %c0_16, %c1, %c0_17] : memref<1x1x1x18x18x4xf32, #tpu.memory_space<vmem>>, vector<1x1x1x16x16x4xf32>
    %12 = vector.shape_cast %11 : vector<1x1x1x16x16x4xf32> to vector<16x16x4xf32>
    %13 = vector.shape_cast %12 : vector<16x16x4xf32> to vector<256x4xf32>
    %c0_18 = arith.constant 0 : index
    %c0_19 = arith.constant 0 : index
    %c1_20 = arith.constant 1 : index
    %c0_21 = arith.constant 0 : index
    %c0_22 = arith.constant 0 : index
    %14 = vector.load %arg5[%c0_18, %c0_19, %c1_20, %c0_21, %c0_22] : memref<1x3x3x4x8xf32, #tpu.memory_space<vmem>>, vector<1x1x1x4x8xf32>
    %15 = vector.shape_cast %14 : vector<1x1x1x4x8xf32> to vector<4x8xf32>
    %cst_23 = arith.constant dense<0.000000e+00> : vector<256x8xf32>
    %16 = tpu.matmul %13, %15, %cst_23 {dimension_numbers = #tpu.dot_dimension_numbers<[1], [0], [0], [1], [0, 0, 1, 1], [], []>} : vector<256x4xf32>, vector<4x8xf32>, vector<256x8xf32> -> vector<256x8xf32>
    %17 = arith.addf %10, %16 : vector<256x8xf32>
    %c0_24 = arith.constant 0 : index
    %c0_25 = arith.constant 0 : index
    %c0_26 = arith.constant 0 : index
    %c0_27 = arith.constant 0 : index
    %c2 = arith.constant 2 : index
    %c0_28 = arith.constant 0 : index
    %18 = vector.load %arg4[%c0_24, %c0_25, %c0_26, %c0_27, %c2, %c0_28] : memref<1x1x1x18x18x4xf32, #tpu.memory_space<vmem>>, vector<1x1x1x16x16x4xf32>
    %19 = vector.shape_cast %18 : vector<1x1x1x16x16x4xf32> to vector<16x16x4xf32>
    %20 = vector.shape_cast %19 : vector<16x16x4xf32> to vector<256x4xf32>
    %c0_29 = arith.constant 0 : index
    %c0_30 = arith.constant 0 : index
    %c2_31 = arith.constant 2 : index
    %c0_32 = arith.constant 0 : index
    %c0_33 = arith.constant 0 : index
    %21 = vector.load %arg5[%c0_29, %c0_30, %c2_31, %c0_32, %c0_33] : memref<1x3x3x4x8xf32, #tpu.memory_space<vmem>>, vector<1x1x1x4x8xf32>
    %22 = vector.shape_cast %21 : vector<1x1x1x4x8xf32> to vector<4x8xf32>
    %cst_34 = arith.constant dense<0.000000e+00> : vector<256x8xf32>
    %23 = tpu.matmul %20, %22, %cst_34 {dimension_numbers = #tpu.dot_dimension_numbers<[1], [0], [0], [1], [0, 0, 1, 1], [], []>} : vector<256x4xf32>, vector<4x8xf32>, vector<256x8xf32> -> vector<256x8xf32>
    %24 = arith.addf %17, %23 : vector<256x8xf32>
    %c0_35 = arith.constant 0 : index
    %c0_36 = arith.constant 0 : index
    %c0_37 = arith.constant 0 : index
    %c1_38 = arith.constant 1 : index
    %c0_39 = arith.constant 0 : index
    %c0_40 = arith.constant 0 : index
    %25 = vector.load %arg4[%c0_35, %c0_36, %c0_37, %c1_38, %c0_39, %c0_40] : memref<1x1x1x18x18x4xf32, #tpu.memory_space<vmem>>, vector<1x1x1x16x16x4xf32>
    %26 = vector.shape_cast %25 : vector<1x1x1x16x16x4xf32> to vector<16x16x4xf32>
    %27 = vector.shape_cast %26 : vector<16x16x4xf32> to vector<256x4xf32>
    %c0_41 = arith.constant 0 : index
    %c1_42 = arith.constant 1 : index
    %c0_43 = arith.constant 0 : index
    %c0_44 = arith.constant 0 : index
    %c0_45 = arith.constant 0 : index
    %28 = vector.load %arg5[%c0_41, %c1_42, %c0_43, %c0_44, %c0_45] : memref<1x3x3x4x8xf32, #tpu.memory_space<vmem>>, vector<1x1x1x4x8xf32>
    %29 = vector.shape_cast %28 : vector<1x1x1x4x8xf32> to vector<4x8xf32>
    %cst_46 = arith.constant dense<0.000000e+00> : vector<256x8xf32>
    %30 = tpu.matmul %27, %29, %cst_46 {dimension_numbers = #tpu.dot_dimension_numbers<[1], [0], [0], [1], [0, 0, 1, 1], [], []>} : vector<256x4xf32>, vector<4x8xf32>, vector<256x8xf32> -> vector<256x8xf32>
    %31 = arith.addf %24, %30 : vector<256x8xf32>
    %c0_47 = arith.constant 0 : index
    %c0_48 = arith.constant 0 : index
    %c0_49 = arith.constant 0 : index
    %c1_50 = arith.constant 1 : index
    %c1_51 = arith.constant 1 : index
    %c0_52 = arith.constant 0 : index
    %32 = vector.load %arg4[%c0_47, %c0_48, %c0_49, %c1_50, %c1_51, %c0_52] : memref<1x1x1x18x18x4xf32, #tpu.memory_space<vmem>>, vector<1x1x1x16x16x4xf32>
    %33 = vector.shape_cast %32 : vector<1x1x1x16x16x4xf32> to vector<16x16x4xf32>
    %34 = vector.shape_cast %33 : vector<16x16x4xf32> to vector<256x4xf32>
    %c0_53 = arith.constant 0 : index
    %c1_54 = arith.constant 1 : index
    %c1_55 = arith.constant 1 : index
    %c0_56 = arith.constant 0 : index
    %c0_57 = arith.constant 0 : index
    %35 = vector.load %arg5[%c0_53, %c1_54, %c1_55, %c0_56, %c0_57] : memref<1x3x3x4x8xf32, #tpu.memory_space<vmem>>, vector<1x1x1x4x8xf32>
    %36 = vector.shape_cast %35 : vector<1x1x1x4x8xf32> to vector<4x8xf32>
    %cst_58 = arith.constant dense<0.000000e+00> : vector<256x8xf32>
    %37 = tpu.matmul %34, %36, %cst_58 {dimension_numbers = #tpu.dot_dimension_numbers<[1], [0], [0], [1], [0, 0, 1, 1], [], []>} : vector<256x4xf32>, vector<4x8xf32>, vector<256x8xf32> -> vector<256x8xf32>
    %38 = arith.addf %31, %37 : vector<256x8xf32>
    %c0_59 = arith.constant 0 : index
    %c0_60 = arith.constant 0 : index
    %c0_61 = arith.constant 0 : index
    %c1_62 = arith.constant 1 : index
    %c2_63 = arith.constant 2 : index
    %c0_64 = arith.constant 0 : index
    %39 = vector.load %arg4[%c0_59, %c0_60, %c0_61, %c1_62, %c2_63, %c0_64] : memref<1x1x1x18x18x4xf32, #tpu.memory_space<vmem>>, vector<1x1x1x16x16x4xf32>
    %40 = vector.shape_cast %39 : vector<1x1x1x16x16x4xf32> to vector<16x16x4xf32>
    %41 = vector.shape_cast %40 : vector<16x16x4xf32> to vector<256x4xf32>
    %c0_65 = arith.constant 0 : index
    %c1_66 = arith.constant 1 : index
    %c2_67 = arith.constant 2 : index
    %c0_68 = arith.constant 0 : index
    %c0_69 = arith.constant 0 : index
    %42 = vector.load %arg5[%c0_65, %c1_66, %c2_67, %c0_68, %c0_69] : memref<1x3x3x4x8xf32, #tpu.memory_space<vmem>>, vector<1x1x1x4x8xf32>
    %43 = vector.shape_cast %42 : vector<1x1x1x4x8xf32> to vector<4x8xf32>
    %cst_70 = arith.constant dense<0.000000e+00> : vector<256x8xf32>
    %44 = tpu.matmul %41, %43, %cst_70 {dimension_numbers = #tpu.dot_dimension_numbers<[1], [0], [0], [1], [0, 0, 1, 1], [], []>} : vector<256x4xf32>, vector<4x8xf32>, vector<256x8xf32> -> vector<256x8xf32>
    %45 = arith.addf %38, %44 : vector<256x8xf32>
    %c0_71 = arith.constant 0 : index
    %c0_72 = arith.constant 0 : index
    %c0_73 = arith.constant 0 : index
    %c2_74 = arith.constant 2 : index
    %c0_75 = arith.constant 0 : index
    %c0_76 = arith.constant 0 : index
    %46 = vector.load %arg4[%c0_71, %c0_72, %c0_73, %c2_74, %c0_75, %c0_76] : memref<1x1x1x18x18x4xf32, #tpu.memory_space<vmem>>, vector<1x1x1x16x16x4xf32>
    %47 = vector.shape_cast %46 : vector<1x1x1x16x16x4xf32> to vector<16x16x4xf32>
    %48 = vector.shape_cast %47 : vector<16x16x4xf32> to vector<256x4xf32>
    %c0_77 = arith.constant 0 : index
    %c2_78 = arith.constant 2 : index
    %c0_79 = arith.constant 0 : index
    %c0_80 = arith.constant 0 : index
    %c0_81 = arith.constant 0 : index
    %49 = vector.load %arg5[%c0_77, %c2_78, %c0_79, %c0_80, %c0_81] : memref<1x3x3x4x8xf32, #tpu.memory_space<vmem>>, vector<1x1x1x4x8xf32>
    %50 = vector.shape_cast %49 : vector<1x1x1x4x8xf32> to vector<4x8xf32>
    %cst_82 = arith.constant dense<0.000000e+00> : vector<256x8xf32>
    %51 = tpu.matmul %48, %50, %cst_82 {dimension_numbers = #tpu.dot_dimension_numbers<[1], [0], [0], [1], [0, 0, 1, 1], [], []>} : vector<256x4xf32>, vector<4x8xf32>, vector<256x8xf32> -> vector<256x8xf32>
    %52 = arith.addf %45, %51 : vector<256x8xf32>
    %c0_83 = arith.constant 0 : index
    %c0_84 = arith.constant 0 : index
    %c0_85 = arith.constant 0 : index
    %c2_86 = arith.constant 2 : index
    %c1_87 = arith.constant 1 : index
    %c0_88 = arith.constant 0 : index
    %53 = vector.load %arg4[%c0_83, %c0_84, %c0_85, %c2_86, %c1_87, %c0_88] : memref<1x1x1x18x18x4xf32, #tpu.memory_space<vmem>>, vector<1x1x1x16x16x4xf32>
    %54 = vector.shape_cast %53 : vector<1x1x1x16x16x4xf32> to vector<16x16x4xf32>
    %55 = vector.shape_cast %54 : vector<16x16x4xf32> to vector<256x4xf32>
    %c0_89 = arith.constant 0 : index
    %c2_90 = arith.constant 2 : index
    %c1_91 = arith.constant 1 : index
    %c0_92 = arith.constant 0 : index
    %c0_93 = arith.constant 0 : index
    %56 = vector.load %arg5[%c0_89, %c2_90, %c1_91, %c0_92, %c0_93] : memref<1x3x3x4x8xf32, #tpu.memory_space<vmem>>, vector<1x1x1x4x8xf32>
    %57 = vector.shape_cast %56 : vector<1x1x1x4x8xf32> to vector<4x8xf32>
    %cst_94 = arith.constant dense<0.000000e+00> : vector<256x8xf32>
    %58 = tpu.matmul %55, %57, %cst_94 {dimension_numbers = #tpu.dot_dimension_numbers<[1], [0], [0], [1], [0, 0, 1, 1], [], []>} : vector<256x4xf32>, vector<4x8xf32>, vector<256x8xf32> -> vector<256x8xf32>
    %59 = arith.addf %52, %58 : vector<256x8xf32>
    %c0_95 = arith.constant 0 : index
    %c0_96 = arith.constant 0 : index
    %c0_97 = arith.constant 0 : index
    %c2_98 = arith.constant 2 : index
    %c2_99 = arith.constant 2 : index
    %c0_100 = arith.constant 0 : index
    %60 = vector.load %arg4[%c0_95, %c0_96, %c0_97, %c2_98, %c2_99, %c0_100] : memref<1x1x1x18x18x4xf32, #tpu.memory_space<vmem>>, vector<1x1x1x16x16x4xf32>
    %61 = vector.shape_cast %60 : vector<1x1x1x16x16x4xf32> to vector<16x16x4xf32>
    %62 = vector.shape_cast %61 : vector<16x16x4xf32> to vector<256x4xf32>
    %c0_101 = arith.constant 0 : index
    %c2_102 = arith.constant 2 : index
    %c2_103 = arith.constant 2 : index
    %c0_104 = arith.constant 0 : index
    %c0_105 = arith.constant 0 : index
    %63 = vector.load %arg5[%c0_101, %c2_102, %c2_103, %c0_104, %c0_105] : memref<1x3x3x4x8xf32, #tpu.memory_space<vmem>>, vector<1x1x1x4x8xf32>
    %64 = vector.shape_cast %63 : vector<1x1x1x4x8xf32> to vector<4x8xf32>
    %cst_106 = arith.constant dense<0.000000e+00> : vector<256x8xf32>
    %65 = tpu.matmul %62, %64, %cst_106 {dimension_numbers = #tpu.dot_dimension_numbers<[1], [0], [0], [1], [0, 0, 1, 1], [], []>} : vector<256x4xf32>, vector<4x8xf32>, vector<256x8xf32> -> vector<256x8xf32>
    %66 = arith.addf %59, %65 : vector<256x8xf32>
    %67 = vector.shape_cast %66 : vector<256x8xf32> to vector<16x16x8xf32>
    %c0_107 = arith.constant 0 : index
    %c0_108 = arith.constant 0 : index
    %c0_109 = arith.constant 0 : index
    %c0_110 = arith.constant 0 : index
    %c0_111 = arith.constant 0 : index
    %c0_112 = arith.constant 0 : index
    %68 = vector.load %arg7[%c0_107, %c0_108, %c0_109, %c0_110, %c0_111, %c0_112] : memref<1x1x1x16x16x8xf32, #tpu.memory_space<vmem>>, vector<1x1x1x16x16x8xf32>
    %69 = vector.shape_cast %68 : vector<1x1x1x16x16x8xf32> to vector<16x16x8xf32>
    %70 = vector.shape_cast %67 : vector<16x16x8xf32> to vector<1x1x1x16x16x8xf32>
    tpu.vector_store %arg7[%c0_107, %c0_108, %c0_109, %c0_110, %c0_111, %c0_112], %70 {strides = array<i32>} : memref<1x1x1x16x16x8xf32, #tpu.memory_space<vmem>>, vector<1x1x1x16x16x8xf32>,
    return
  }
  func.func @transform_0(%arg0: i32, %arg1: i32, %arg2: i32, %arg3: i32) -> (i32, i32, i32, i32, i32, i32) {
    %c0_i32 = arith.constant 0 : i32
    %c0_i32_0 = arith.constant 0 : i32
    %c0_i32_1 = arith.constant 0 : i32
    %c0_i32_2 = arith.constant 0 : i32
    return %arg0, %arg1, %arg2, %c0_i32, %c0_i32_0, %c0_i32_1 : i32, i32, i32, i32, i32, i32
  }
  func.func @transform_1(%arg0: i32, %arg1: i32, %arg2: i32, %arg3: i32) -> (i32, i32, i32, i32, i32) {
    %c0_i32 = arith.constant 0 : i32
    %c0_i32_0 = arith.constant 0 : i32
    %c0_i32_1 = arith.constant 0 : i32
    %c0_i32_2 = arith.constant 0 : i32
    return %arg1, %c0_i32, %c0_i32_0, %c0_i32_1, %arg3 : i32, i32, i32, i32, i32
  }
  func.func @transform_2(%arg0: i32, %arg1: i32, %arg2: i32, %arg3: i32) -> (i32, i32, i32) {
    %c0_i32 = arith.constant 0 : i32
    %c0_i32_0 = arith.constant 0 : i32
    return %arg1, %c0_i32, %arg3 : i32, i32, i32
  }
  func.func @transform_3(%arg0: i32, %arg1: i32, %arg2: i32, %arg3: i32) -> (i32, i32, i32, i32, i32, i32) {
    %c0_i32 = arith.constant 0 : i32
    %c0_i32_0 = arith.constant 0 : i32
    %c0_i32_1 = arith.constant 0 : i32
    return %arg0, %arg1, %arg2, %c0_i32, %c0_i32_0, %arg3 : i32, i32, i32, i32, i32, i32
  }
}

</mosaic_0001>

<bundles_post_ra>
// kernel: tpu_custom_call.1
= control target key start
LH: loop header
LB: loop body
LE: loop exit
PB: predicated region body
PF: predicated region fallthrough
CT: control target
= control target key end

     0   :  { %s5358_s12 = smov 0   ;;  %s5360_s13 = smov 0   ;;  %s6909_s0 = inlined_call_operand.vmem [shape: f32[2,1,1,18,18,4], index: 0, kind: input, shape index: {}]   ;;  %s6910_s1 = inlined_call_operand.vmem [shape: f32[1,3,3,4,8], index: 1, kind: input, shape index: {}]   ;;  %s6911_s2 = inlined_call_operand.vmem [shape: f32[1,1,8], index: 2, kind: input, shape index: {}]   ;;  %s6912_s3 = inlined_call_operand.vmem [shape: f32[2,1,1,16,16,8], index: 3, kind: output, shape index: {}]  }
   0x1   :  { %s5362_s14 = smov 0  }
   0x2 LB: > { %s39_s15 = sadd.s32 1, %s5332_s13  ;;  %p4035_p0 = scmp.ge.s32.totalorder %s5336_s14, 1  ;;  %s5336_s14 = sphi %s5362_s14, %s13_s14   ;;  %s5332_s13 = sphi %s5360_s13, %s7136_s13   ;;  %s5328_s12 = sphi %s5358_s12, %s7135_s12  }
   0x3   : > { %p41_p1 = scmp.ge.s32.totalorder %s39_s15, 2  ;;  %p209_p2 = scmp.lt.s32.totalorder %s5336_s14, 3 }
   0x5   : > { %s7138_s15 = smov (%p41_p1, %s39_s15), 0  ;;  %p210_p3 = pnand %p4035_p0, %p209_p2 }
   0x7   : > { %213 = sbr.rel (%p210_p3) target bundleno = 505 (0x1f9), region = 32 }
   0xc   : > { %v348_v0 = vld [vmem:[%s6910_s1] sm:$0xf]  ;;  %vm446_vm0 = vcmask 1043456   ;;  %p266_p4 = scmp.lt.s32.totalorder %s5328_s12, 1  ;;  %v4073_v1 = vld [vmem:[%s6910_s1 + $0x4] sm:$0xf] }
   0xd   : > { %5287 = vmatprep.subr.msk.mxu1 %vm446_vm0, %v348_v0  ;;  %4837 = vmatprep.subr.msk.mxu0 %vm446_vm0, %v348_v0  ;;  %v4107_v2 = vld [vmem:[%s6910_s1 + $0x8] sm:$0xf]  ;;  %vm349_vm1 = vcmask 31744   ;;  %v5422_v9 = vld [vmem:[%s6910_s1 + $0xc] sm:$0xf]  ;;  %vm3829_vm2 = vcmask 64512  }
   0xe   : > { %5288 = vmatpush3.msk.msra.mxu1 %vm446_vm0, %v348_v0  ;;  %4838 = vmatpush3.msk.msra.mxu0 %vm446_vm0, %v348_v0  ;;  %s7140_s12 = smov (!%p266_p4, %s5328_s12), 1  ;;  %v5427_v10 = vld [vmem:[%s6910_s1 + $0x10] sm:$0xf]  ;;  %v5586_v43 = vld [vmem:[%s6910_s1 + $0x14] sm:$0xf] }
   0xf   : > { %4887 = vmatprep.subr.msk.mxu1 %vm446_vm0, %v4073_v1  ;;  %4937 = vmatprep.subr.msk.mxu0 %vm446_vm0, %v4107_v2  ;;  %s5289_s22 = smul.u32 432, %s7140_s12  ;;  %v5591_v44 = vld [vmem:[%s6910_s1 + $0x18] sm:$0xf]  ;;  %s4539_s17 = sshll.u32 %s7140_s12, 8 }
  0x10   : > { %s6748_s20 = scalar_lea.vmem %s6912_s3, %s4539_s17 }
  0x11   : > { %s5397_s25 = scalar_lea.vmem %s6909_s0, %s5289_s22 }
  0x12   : > { %v316_v3 = vld [vmem:[%s5397_s25] sm:$0xff]  ;;  %v317_v5 = vld [vmem:[%s5397_s25 + $0x8] sm:$0xff]  ;;  %v5411_v7 = vld [vmem:[%s5397_s25 + $0x18] sm:$0xff] }
  0x13   : > { %v5401_v4 = vld [vmem:[%s5397_s25 + $0xc0] sm:$0xff]  ;;  %4839 = vmatprep.mubr.msk.f32.mxu0 %vm349_vm1, %v316_v3  ;;  %v5408_v6 = vld [vmem:[%s5397_s25 + $0xc8] sm:$0xff]  ;;  %v5414_v8 = vld [vmem:[%s5397_s25 + $0xd8] sm:$0xff] }
  0x14   : > { %4863 = vmatprep.mubr.msk.f32.mxu1 %vm349_vm1, %v5401_v4  ;;  %4840 = vmatmul.mubr.msk.f32.vlgmr.msra.gmra.mxu0 %vm349_vm1, %v317_v5  ;;  %v5432_v11 = vld [vmem:[%s5397_s25 + $0x20] sm:$0xff]  ;;  %v5442_v13 = vld [vmem:[%s5397_s25 + $0x30] sm:$0xff]  ;;  %v5460_v15 = vld [vmem:[%s5397_s25 + $0x38] sm:$0xff] }
  0x15   : > { %4864 = vmatmul.mubr.msk.f32.vlgmr.msra.gmra.mxu1 %vm349_vm1, %v5408_v6  ;;  %4938 = vmatpush3.msk.msra.mxu0 %vm446_vm0, %v4107_v2  ;;  %v5435_v12 = vld [vmem:[%s5397_s25 + $0xe0] sm:$0xff]  ;;  %v5445_v14 = vld [vmem:[%s5397_s25 + $0xf0] sm:$0xff]  ;;  %v5463_v16 = vld [vmem:[%s5397_s25 + $0xf8] sm:$0xff] }
  0x16   : > { %4888 = vmatpush3.msk.msra.mxu1 %vm446_vm0, %v4073_v1  ;;  %4842 = vmatprep.mubr.msk.f32.mxu0 %vm349_vm1, %v5411_v7  ;;  %v5466_v17 = vld [vmem:[%s5397_s25 + $0x48] sm:$0xff]  ;;  %v5480_v19 = vld [vmem:[%s5397_s25 + $0x50] sm:$0xff]  ;;  %v5486_v21 = vld [vmem:[%s5397_s25 + $0x60] sm:$0xff] }
  0x17   : > { %4866 = vmatprep.mubr.msk.f32.mxu1 %vm349_vm1, %v5414_v8  ;;  %4987 = vmatprep.subr.msk.mxu1 %vm446_vm0, %v5422_v9  ;;  %v5469_v18 = vld [vmem:[%s5397_s25 + $0x108] sm:$0xff]  ;;  %v5483_v20 = vld [vmem:[%s5397_s25 + $0x110] sm:$0xff]  ;;  %v5489_v22 = vld [vmem:[%s5397_s25 + $0x120] sm:$0xff] }
  0x18   : > { %5037 = vmatprep.subr.msk.mxu0 %vm446_vm0, %v5427_v10  ;;  %4843 = vmatmul.mubr.msk.f32.gmra.mxu0 %vm349_vm1, %v5432_v11  ;;  %v5500_v23 = vld [vmem:[%s5397_s25 + $0x68] sm:$0xff]  ;;  %v5506_v25 = vld [vmem:[%s5397_s25 + $0x78] sm:$0xff]  ;;  %v5520_v27 = vld [vmem:[%s5397_s25 + $0x80] sm:$0xff] }
  0x19   : > { %4867 = vmatmul.mubr.msk.f32.gmra.mxu1 %vm349_vm1, %v5435_v12  ;;  %4845 = vmatprep.mubr.msk.f32.mxu0 %vm349_vm1, %v5442_v13  ;;  %v5503_v24 = vld [vmem:[%s5397_s25 + $0x128] sm:$0xff]  ;;  %v5509_v26 = vld [vmem:[%s5397_s25 + $0x138] sm:$0xff]  ;;  %v5523_v28 = vld [vmem:[%s5397_s25 + $0x140] sm:$0xff] }
  0x1a   : > { %4869 = vmatprep.mubr.msk.f32.mxu1 %vm349_vm1, %v5445_v14  ;;  %v5526_v29 = vld [vmem:[%s5397_s25 + $0x90] sm:$0xff]  ;;  %v5540_v31 = vld [vmem:[%s5397_s25 + $0x98] sm:$0xff]  ;;  %v5546_v33 = vld [vmem:[%s5397_s25 + $0xa8] sm:$0xff] }
  0x1b   : > { %v5529_v30 = vld [vmem:[%s5397_s25 + $0x150] sm:$0xff]  ;;  %v5543_v32 = vld [vmem:[%s5397_s25 + $0x158] sm:$0xff]  ;;  %v5549_v34 = vld [vmem:[%s5397_s25 + $0x168] sm:$0xff] }
  0x1c   : > { %4846 = vmatmul.mubr.msk.f32.gmra.mxu0 %vm349_vm1, %v5460_v15  ;;  %v5560_v35 = vld [vmem:[%s5397_s25 + $0xb0] sm:$0xff]  ;;  %v707_v37 = vld [vmem:[%s5397_s25 + $0x1] sm:$0xff]  ;;  %v5576_v41 = vld [vmem:[%s5397_s25 + $0x19] sm:$0xff] }
  0x1d   : > { %4870 = vmatmul.mubr.msk.f32.gmra.mxu1 %vm349_vm1, %v5463_v16  ;;  %4848 = vmatprep.mubr.msk.f32.mxu0 %vm349_vm1, %v5466_v17  ;;  %v5563_v36 = vld [vmem:[%s5397_s25 + $0x170] sm:$0xff]  ;;  %v1097_v38 = vld [vmem:[%s5397_s25 + $0x2] sm:$0xff]  ;;  %v5579_v42 = vld [vmem:[%s5397_s25 + $0x1a] sm:$0xff] }
  0x1e   : > { %4872 = vmatprep.mubr.msk.f32.mxu1 %vm349_vm1, %v5469_v18  ;;  %6965 = vst [vmem:[#allocation2_spill] sm:$0xff] %v5563_v36  ;;  %v708_v39 = vld [vmem:[%s5397_s25 + $0x9] sm:$0xff]  ;;  %6966 = vst [vmem:[#allocation3_spill] sm:$0xff] %v5579_v42  ;;  %v5598_v45 = vld [vmem:[%s5397_s25 + $0x21] sm:$0xff] }
  0x1f   : > { %v1098_v40 = vld [vmem:[%s5397_s25 + $0xa] sm:$0xff]  ;;  %v5601_v46 = vld [vmem:[%s5397_s25 + $0x22] sm:$0xff]  ;;  %v5611_v48 = vld [vmem:[%s5397_s25 + $0x32] sm:$0xff] }
  0x20   : > { %4849 = vmatmul.mubr.msk.f32.gmra.mxu0 %vm349_vm1, %v5480_v19  ;;  %6967 = vst [vmem:[#allocation4_spill] sm:$0xff] %v5601_v46  ;;  %v5608_v47 = vld [vmem:[%s5397_s25 + $0x31] sm:$0xff]  ;;  %6968 = vst [vmem:[#allocation5_spill] sm:$0xff] %v5611_v48  ;;  %v5626_v49 = vld [vmem:[%s5397_s25 + $0x39] sm:$0xff] }
  0x21   : > { %4873 = vmatmul.mubr.msk.f32.gmra.mxu1 %vm349_vm1, %v5483_v20  ;;  %4851 = vmatprep.mubr.msk.f32.mxu0 %vm349_vm1, %v5486_v21  ;;  %v5629_v50 = vld [vmem:[%s5397_s25 + $0x3a] sm:$0xff]  ;;  %v5632_v51 = vld [vmem:[%s5397_s25 + $0x49] sm:$0xff]  ;;  %v5646_v53 = vld [vmem:[%s5397_s25 + $0x51] sm:$0xff] }
  0x22   : > { %4875 = vmatprep.mubr.msk.f32.mxu1 %vm349_vm1, %v5489_v22  ;;  %6969 = vst [vmem:[#allocation6_spill] sm:$0xff] %v5629_v50  ;;  %v5635_v52 = vld [vmem:[%s5397_s25 + $0x4a] sm:$0xff]  ;;  %v5649_v54 = vld [vmem:[%s5397_s25 + $0x52] sm:$0xff]  ;;  %v5652_v55 = vld [vmem:[%s5397_s25 + $0x61] sm:$0xff] }
  0x23   : > { %6970 = vst [vmem:[#allocation7_spill] sm:$0xff] %v5635_v52  ;;  %6971 = vst [vmem:[#allocation8_spill] sm:$0xff] %v5649_v54  ;;  %v5655_v56 = vld [vmem:[%s5397_s25 + $0x62] sm:$0xff]  ;;  %v5669_v58 = vld [vmem:[%s5397_s25 + $0x6a] sm:$0xff] }
  0x24   : > { %4852 = vmatmul.mubr.msk.f32.gmra.mxu0 %vm349_vm1, %v5500_v23  ;;  %6972 = vst [vmem:[#allocation9_spill] sm:$0xff] %v5655_v56  ;;  %v5666_v57 = vld [vmem:[%s5397_s25 + $0x69] sm:$0xff]  ;;  %6973 = vst [vmem:[#allocation10_spill] sm:$0xff] %v5669_v58  ;;  %v5672_v59 = vld [vmem:[%s5397_s25 + $0x79] sm:$0xff] }
  0x25   : > { %4876 = vmatmul.mubr.msk.f32.gmra.mxu1 %vm349_vm1, %v5503_v24  ;;  %4854 = vmatprep.mubr.msk.f32.mxu0 %vm349_vm1, %v5506_v25  ;;  %v5675_v60 = vld [vmem:[%s5397_s25 + $0x7a] sm:$0xff]  ;;  %v5689_v62 = vld [vmem:[%s5397_s25 + $0x82] sm:$0xff]  ;;  %v5692_v63 = vld [vmem:[%s5397_s25 + $0x91] sm:$0xff] }
  0x26   : > { %4878 = vmatprep.mubr.msk.f32.mxu1 %vm349_vm1, %v5509_v26  ;;  %6974 = vst [vmem:[#allocation11_spill] sm:$0xff] %v5675_v60  ;;  %v5686_v61 = vld [vmem:[%s5397_s25 + $0x81] sm:$0xff]  ;;  %6975 = vst [vmem:[#allocation12_spill] sm:$0xff] %v5689_v62  ;;  %v5695_v0 = vld [vmem:[%s5397_s25 + $0x92] sm:$0xff] }
  0x27   : > { %6976 = vst [vmem:[#allocation13_spill] sm:$0xff] %v5695_v0  ;;  %v5706_v1 = vld [vmem:[%s5397_s25 + $0x99] sm:$0xff]  ;;  %v5712_v3 = vld [vmem:[%s5397_s25 + $0xa9] sm:$0xff] }
  0x28   : > { %4855 = vmatmul.mubr.msk.f32.gmra.mxu0 %vm349_vm1, %v5520_v27  ;;  %v5709_v2 = vld [vmem:[%s5397_s25 + $0x9a] sm:$0xff]  ;;  %v5715_v5 = vld [vmem:[%s5397_s25 + $0xaa] sm:$0xff] }
  0x29   : > { %4879 = vmatmul.mubr.msk.f32.gmra.mxu1 %vm349_vm1, %v5523_v28  ;;  %4857 = vmatprep.mubr.msk.f32.mxu0 %vm349_vm1, %v5526_v29  ;;  %6977 = vst [vmem:[#allocation14_spill] sm:$0xff] %v5709_v2  ;;  %6978 = vst [vmem:[#allocation15_spill] sm:$0xff] %v5715_v5 }
  0x2a   : > { %4881 = vmatprep.mubr.msk.f32.mxu1 %vm349_vm1, %v5529_v30 }
  0x2c   : > { %4858 = vmatmul.mubr.msk.f32.gmra.mxu0 %vm349_vm1, %v5540_v31 }
  0x2d   : > { %4882 = vmatmul.mubr.msk.f32.gmra.mxu1 %vm349_vm1, %v5543_v32  ;;  %4860 = vmatprep.mubr.msk.f32.mxu0 %vm349_vm1, %v5546_v33 }
  0x2e   : > { %4884 = vmatprep.mubr.msk.f32.mxu1 %vm349_vm1, %v5549_v34 }
  0x30   : > { %4861 = vmatmul.mubr.msk.f32.gmra.mxu0 %vm349_vm1, %v5560_v35 }
  0x31   : > { %4885 = vmatmul.mubr.msk.f32.gmra.mxu1 %vm349_vm1, %v5563_v36  ;;  %4939 = vmatprep.mubr.msk.f32.mxu0 %vm349_vm1, %v1097_v38  ;;  %v5735_v38 = vld [vmem:[%s5397_s25 + $0xc2] sm:$0xff]  ;;  %v5875_v36 = vld [vmem:[%s5397_s25 + $0x16a] sm:$0xff] }
  0x32   : > { %4889 = vmatprep.mubr.msk.f32.mxu1 %vm349_vm1, %v707_v37  ;;  %v5732_v37 = vld [vmem:[%s5397_s25 + $0xc1] sm:$0xff]  ;;  %6980 = vst [vmem:[#allocation17_spill] sm:$0xff] %v5735_v38  ;;  %6993 = vst [vmem:[#allocation30_spill] sm:$0xff] %v5875_v36 }
  0x34   : > { %4940 = vmatmul.mubr.msk.f32.vlgmr.msra.gmra.mxu0 %vm349_vm1, %v1098_v40  ;;  %v5749_v40 = vld [vmem:[%s5397_s25 + $0xca] sm:$0xff] }
  0x35   : > { %4890 = vmatmul.mubr.msk.f32.vlgmr.msra.gmra.mxu1 %vm349_vm1, %v708_v39  ;;  %5038 = vmatpush3.msk.msra.mxu0 %vm446_vm0, %v5427_v10  ;;  %v5729_v10 = vld [vmem:[%s5397_s25 + $0xb2] sm:$0xff]  ;;  %v5746_v39 = vld [vmem:[%s5397_s25 + $0xc9] sm:$0xff]  ;;  %6981 = vst [vmem:[#allocation18_spill] sm:$0xff] %v5749_v40 }
  0x36   : > { %4988 = vmatpush3.msk.msra.mxu1 %vm446_vm0, %v5422_v9  ;;  %4892 = vmatprep.mubr.msk.f32.mxu1 %vm349_vm1, %v5576_v41  ;;  %v5726_v9 = vld [vmem:[%s5397_s25 + $0xb1] sm:$0xff]  ;;  %6979 = vst [vmem:[#allocation16_spill] sm:$0xff] %v5729_v10 }
  0x37   : > { %4942 = vmatprep.mubr.msk.f32.mxu0 %vm349_vm1, %v5579_v42  ;;  %5087 = vmatprep.subr.msk.mxu1 %vm446_vm0, %v5586_v43  ;;  %v5872_v42 = vld [vmem:[%s5397_s25 + $0x169] sm:$0xff] }
  0x38   : > { %5137 = vmatprep.subr.msk.mxu0 %vm446_vm0, %v5591_v44  ;;  %4943 = vmatmul.mubr.msk.f32.gmra.mxu0 %vm349_vm1, %v5601_v46  ;;  %v5855_v46 = vld [vmem:[%s5397_s25 + $0x152] sm:$0xff] }
  0x39   : > { %4893 = vmatmul.mubr.msk.f32.gmra.mxu1 %vm349_vm1, %v5598_v45  ;;  %4945 = vmatprep.mubr.msk.f32.mxu0 %vm349_vm1, %v5611_v48  ;;  %v5852_v48 = vld [vmem:[%s5397_s25 + $0x151] sm:$0xff]  ;;  %6992 = vst [vmem:[#allocation29_spill] sm:$0xff] %v5855_v46 }
  0x3a   : > { %4895 = vmatprep.mubr.msk.f32.mxu1 %vm349_vm1, %v5608_v47 }
  0x3c   : > { %4946 = vmatmul.mubr.msk.f32.gmra.mxu0 %vm349_vm1, %v5629_v50  ;;  %v5835_v50 = vld [vmem:[%s5397_s25 + $0x13a] sm:$0xff] }
  0x3d   : > { %4896 = vmatmul.mubr.msk.f32.gmra.mxu1 %vm349_vm1, %v5626_v49  ;;  %4948 = vmatprep.mubr.msk.f32.mxu0 %vm349_vm1, %v5635_v52  ;;  %v5832_v52 = vld [vmem:[%s5397_s25 + $0x139] sm:$0xff]  ;;  %6990 = vst [vmem:[#allocation27_spill] sm:$0xff] %v5835_v50 }
  0x3e   : > { %4898 = vmatprep.mubr.msk.f32.mxu1 %vm349_vm1, %v5632_v51 }
  0x40   : > { %4949 = vmatmul.mubr.msk.f32.gmra.mxu0 %vm349_vm1, %v5649_v54  ;;  %v5815_v54 = vld [vmem:[%s5397_s25 + $0x122] sm:$0xff] }
  0x41   : > { %4899 = vmatmul.mubr.msk.f32.gmra.mxu1 %vm349_vm1, %v5646_v53  ;;  %4951 = vmatprep.mubr.msk.f32.mxu0 %vm349_vm1, %v5655_v56  ;;  %v5812_v56 = vld [vmem:[%s5397_s25 + $0x121] sm:$0xff]  ;;  %6988 = vst [vmem:[#allocation25_spill] sm:$0xff] %v5815_v54 }
  0x42   : > { %4901 = vmatprep.mubr.msk.f32.mxu1 %vm349_vm1, %v5652_v55 }
  0x44   : > { %4952 = vmatmul.mubr.msk.f32.gmra.mxu0 %vm349_vm1, %v5669_v58  ;;  %v5795_v58 = vld [vmem:[%s5397_s25 + $0x10a] sm:$0xff] }
  0x45   : > { %4902 = vmatmul.mubr.msk.f32.gmra.mxu1 %vm349_vm1, %v5666_v57  ;;  %4954 = vmatprep.mubr.msk.f32.mxu0 %vm349_vm1, %v5675_v60  ;;  %v5792_v60 = vld [vmem:[%s5397_s25 + $0x109] sm:$0xff]  ;;  %6986 = vst [vmem:[#allocation23_spill] sm:$0xff] %v5795_v58 }
  0x46   : > { %4904 = vmatprep.mubr.msk.f32.mxu1 %vm349_vm1, %v5672_v59 }
  0x48   : > { %4955 = vmatmul.mubr.msk.f32.gmra.mxu0 %vm349_vm1, %v5689_v62  ;;  %v5775_v62 = vld [vmem:[%s5397_s25 + $0xf2] sm:$0xff] }
  0x49   : > { %4905 = vmatmul.mubr.msk.f32.gmra.mxu1 %vm349_vm1, %v5686_v61  ;;  %4957 = vmatprep.mubr.msk.f32.mxu0 %vm349_vm1, %v5695_v0  ;;  %v5772_v0 = vld [vmem:[%s5397_s25 + $0xf1] sm:$0xff]  ;;  %6984 = vst [vmem:[#allocation21_spill] sm:$0xff] %v5775_v62 }
  0x4a   : > { %4907 = vmatprep.mubr.msk.f32.mxu1 %vm349_vm1, %v5692_v63 }
  0x4c   : > { %4958 = vmatmul.mubr.msk.f32.gmra.mxu0 %vm349_vm1, %v5709_v2  ;;  %v5755_v2 = vld [vmem:[%s5397_s25 + $0xda] sm:$0xff] }
  0x4d   : > { %4908 = vmatmul.mubr.msk.f32.gmra.mxu1 %vm349_vm1, %v5706_v1  ;;  %4960 = vmatprep.mubr.msk.f32.mxu0 %vm349_vm1, %v5715_v5  ;;  %v5752_v5 = vld [vmem:[%s5397_s25 + $0xd9] sm:$0xff]  ;;  %6982 = vst [vmem:[#allocation19_spill] sm:$0xff] %v5755_v2 }
  0x4e   : > { %4910 = vmatprep.mubr.msk.f32.mxu1 %vm349_vm1, %v5712_v3 }
  0x50   : > { %4961 = vmatmul.mubr.msk.f32.gmra.mxu0 %vm349_vm1, %v5729_v10  ;;  %v5769_v10 = vld [vmem:[%s5397_s25 + $0xe2] sm:$0xff] }
  0x51   : > { %4911 = vmatmul.mubr.msk.f32.gmra.mxu1 %vm349_vm1, %v5726_v9  ;;  %4963 = vmatprep.mubr.msk.f32.mxu0 %vm349_vm1, %v5735_v38  ;;  %v5766_v38 = vld [vmem:[%s5397_s25 + $0xe1] sm:$0xff]  ;;  %6983 = vst [vmem:[#allocation20_spill] sm:$0xff] %v5769_v10 }
  0x52   : > { %4913 = vmatprep.mubr.msk.f32.mxu1 %vm349_vm1, %v5732_v37 }
  0x54   : > { %4964 = vmatmul.mubr.msk.f32.gmra.mxu0 %vm349_vm1, %v5749_v40  ;;  %v5789_v40 = vld [vmem:[%s5397_s25 + $0xfa] sm:$0xff] }
  0x55   : > { %4914 = vmatmul.mubr.msk.f32.gmra.mxu1 %vm349_vm1, %v5746_v39  ;;  %4966 = vmatprep.mubr.msk.f32.mxu0 %vm349_vm1, %v5755_v2  ;;  %v5786_v2 = vld [vmem:[%s5397_s25 + $0xf9] sm:$0xff]  ;;  %6985 = vst [vmem:[#allocation22_spill] sm:$0xff] %v5789_v40 }
  0x56   : > { %4916 = vmatprep.mubr.msk.f32.mxu1 %vm349_vm1, %v5752_v5 }
  0x58   : > { %4967 = vmatmul.mubr.msk.f32.gmra.mxu0 %vm349_vm1, %v5769_v10  ;;  %v5809_v10 = vld [vmem:[%s5397_s25 + $0x112] sm:$0xff] }
  0x59   : > { %4917 = vmatmul.mubr.msk.f32.gmra.mxu1 %vm349_vm1, %v5766_v38  ;;  %4969 = vmatprep.mubr.msk.f32.mxu0 %vm349_vm1, %v5775_v62  ;;  %v5806_v62 = vld [vmem:[%s5397_s25 + $0x111] sm:$0xff]  ;;  %6987 = vst [vmem:[#allocation24_spill] sm:$0xff] %v5809_v10 }
  0x5a   : > { %4919 = vmatprep.mubr.msk.f32.mxu1 %vm349_vm1, %v5772_v0 }
  0x5c   : > { %4970 = vmatmul.mubr.msk.f32.gmra.mxu0 %vm349_vm1, %v5789_v40  ;;  %v5829_v40 = vld [vmem:[%s5397_s25 + $0x12a] sm:$0xff] }
  0x5d   : > { %4920 = vmatmul.mubr.msk.f32.gmra.mxu1 %vm349_vm1, %v5786_v2  ;;  %4972 = vmatprep.mubr.msk.f32.mxu0 %vm349_vm1, %v5795_v58  ;;  %v5826_v58 = vld [vmem:[%s5397_s25 + $0x129] sm:$0xff]  ;;  %6989 = vst [vmem:[#allocation26_spill] sm:$0xff] %v5829_v40 }
  0x5e   : > { %4922 = vmatprep.mubr.msk.f32.mxu1 %vm349_vm1, %v5792_v60 }
  0x60   : > { %4973 = vmatmul.mubr.msk.f32.gmra.mxu0 %vm349_vm1, %v5809_v10  ;;  %v5849_v10 = vld [vmem:[%s5397_s25 + $0x142] sm:$0xff] }
  0x61   : > { %4923 = vmatmul.mubr.msk.f32.gmra.mxu1 %vm349_vm1, %v5806_v62  ;;  %4975 = vmatprep.mubr.msk.f32.mxu0 %vm349_vm1, %v5815_v54  ;;  %v5846_v54 = vld [vmem:[%s5397_s25 + $0x141] sm:$0xff]  ;;  %6991 = vst [vmem:[#allocation28_spill] sm:$0xff] %v5849_v10 }
  0x62   : > { %4925 = vmatprep.mubr.msk.f32.mxu1 %vm349_vm1, %v5812_v56 }
  0x64   : > { %4976 = vmatmul.mubr.msk.f32.gmra.mxu0 %vm349_vm1, %v5829_v40  ;;  %v5869_v40 = vld [vmem:[%s5397_s25 + $0x15a] sm:$0xff] }
  0x65   : > { %4926 = vmatmul.mubr.msk.f32.gmra.mxu1 %vm349_vm1, %v5826_v58  ;;  %4978 = vmatprep.mubr.msk.f32.mxu0 %vm349_vm1, %v5835_v50  ;;  %v5866_v50 = vld [vmem:[%s5397_s25 + $0x159] sm:$0xff] }
  0x66   : > { %4928 = vmatprep.mubr.msk.f32.mxu1 %vm349_vm1, %v5832_v52 }
  0x68   : > { %4979 = vmatmul.mubr.msk.f32.gmra.mxu0 %vm349_vm1, %v5849_v10  ;;  %v5889_v10 = vld [vmem:[%s5397_s25 + $0x172] sm:$0xff] }
  0x69   : > { %4929 = vmatmul.mubr.msk.f32.gmra.mxu1 %vm349_vm1, %v5846_v54  ;;  %4981 = vmatprep.mubr.msk.f32.mxu0 %vm349_vm1, %v5855_v46  ;;  %v5886_v46 = vld [vmem:[%s5397_s25 + $0x171] sm:$0xff]  ;;  %6994 = vst [vmem:[#allocation31_spill] sm:$0xff] %v5889_v10 }
  0x6a   : > { %4931 = vmatprep.mubr.msk.f32.mxu1 %vm349_vm1, %v5852_v48 }
  0x6c   : > { %4982 = vmatmul.mubr.msk.f32.gmra.mxu0 %vm349_vm1, %v5869_v40 }
  0x6d   : > { %4932 = vmatmul.mubr.msk.f32.gmra.mxu1 %vm349_vm1, %v5866_v50  ;;  %4984 = vmatprep.mubr.msk.f32.mxu0 %vm349_vm1, %v5875_v36  ;;  %v5906_v36 = vld [vmem:[%s6910_s1 + $0x1c] sm:$0xf] }
  0x6e   : > { %4934 = vmatprep.mubr.msk.f32.mxu1 %vm349_vm1, %v5872_v42 }
  0x70   : > { %4985 = vmatmul.mubr.msk.f32.gmra.mxu0 %vm349_vm1, %v5889_v10  ;;  %v5911_v10 = vld [vmem:[%s6910_s1 + $0x20] sm:$0xf] }
  0x71   : > { %4935 = vmatmul.mubr.msk.f32.gmra.mxu1 %vm349_vm1, %v5886_v46  ;;  %5039 = vmatprep.mubr.msk.f32.mxu0 %vm349_vm1, %v5576_v41  ;;  %v6996_v41 = vld [vmem:[#allocation2_spill] sm:$0xff] }
  0x72   : > { %4989 = vmatprep.mubr.msk.f32.mxu1 %vm349_vm1, %v5411_v7  ;;  %v6030_v7 = vld [vmem:[%s5397_s25 + $0x180] sm:$0xff] }
  0x74   : > { %5040 = vmatmul.mubr.msk.f32.vlgmr.msra.gmra.mxu0 %vm349_vm1, %v5598_v45  ;;  %v6999_v45 = vld [vmem:[#allocation4_spill] sm:$0xff] }
  0x75   : > { %4990 = vmatmul.mubr.msk.f32.vlgmr.msra.gmra.mxu1 %vm349_vm1, %v5432_v11  ;;  %5138 = vmatpush3.msk.msra.mxu0 %vm446_vm0, %v5591_v44  ;;  %v6033_v11 = vld [vmem:[%s5397_s25 + $0x181] sm:$0xff]  ;;  %v6047_v44 = vld [vmem:[%s5397_s25 + $0x189] sm:$0xff] }
  0x76   : > { %5088 = vmatpush3.msk.msra.mxu1 %vm446_vm0, %v5586_v43  ;;  %4992 = vmatprep.mubr.msk.f32.mxu1 %vm349_vm1, %v5442_v13  ;;  %6995 = vst [vmem:[#allocation32_spill] sm:$0xff] %v6033_v11  ;;  %v6044_v43 = vld [vmem:[%s5397_s25 + $0x188] sm:$0xff]  ;;  %6997 = vst [vmem:[#allocation2_spill] sm:$0xff] %v6047_v44 }
  0x77   : > { %5042 = vmatprep.mubr.msk.f32.mxu0 %vm349_vm1, %v5608_v47  ;;  %5187 = vmatprep.subr.msk.mxu1 %vm446_vm0, %v5906_v36 }
  0x78   : > { %5237 = vmatprep.subr.msk.mxu0 %vm446_vm0, %v5911_v10  ;;  %5043 = vmatmul.mubr.msk.f32.gmra.mxu0 %vm349_vm1, %v5626_v49 }
  0x79   : > { %4993 = vmatmul.mubr.msk.f32.gmra.mxu1 %vm349_vm1, %v5460_v15  ;;  %5045 = vmatprep.mubr.msk.f32.mxu0 %vm349_vm1, %v5632_v51 }
  0x7a   : > { %4995 = vmatprep.mubr.msk.f32.mxu1 %vm349_vm1, %v5466_v17 }
  0x7c   : > { %5046 = vmatmul.mubr.msk.f32.gmra.mxu0 %vm349_vm1, %v5646_v53 }
  0x7d   : > { %4996 = vmatmul.mubr.msk.f32.gmra.mxu1 %vm349_vm1, %v5480_v19  ;;  %5048 = vmatprep.mubr.msk.f32.mxu0 %vm349_vm1, %v5652_v55 }
  0x7e   : > { %4998 = vmatprep.mubr.msk.f32.mxu1 %vm349_vm1, %v5486_v21 }
  0x80   : > { %5049 = vmatmul.mubr.msk.f32.gmra.mxu0 %vm349_vm1, %v5666_v57 }
  0x81   : > { %4999 = vmatmul.mubr.msk.f32.gmra.mxu1 %vm349_vm1, %v5500_v23  ;;  %5051 = vmatprep.mubr.msk.f32.mxu0 %vm349_vm1, %v5672_v59 }
  0x82   : > { %5001 = vmatprep.mubr.msk.f32.mxu1 %vm349_vm1, %v5506_v25 }
  0x84   : > { %5052 = vmatmul.mubr.msk.f32.gmra.mxu0 %vm349_vm1, %v5686_v61 }
  0x85   : > { %5002 = vmatmul.mubr.msk.f32.gmra.mxu1 %vm349_vm1, %v5520_v27  ;;  %5054 = vmatprep.mubr.msk.f32.mxu0 %vm349_vm1, %v5692_v63 }
  0x86   : > { %5004 = vmatprep.mubr.msk.f32.mxu1 %vm349_vm1, %v5526_v29 }
  0x88   : > { %5055 = vmatmul.mubr.msk.f32.gmra.mxu0 %vm349_vm1, %v5706_v1 }
  0x89   : > { %5005 = vmatmul.mubr.msk.f32.gmra.mxu1 %vm349_vm1, %v5540_v31  ;;  %5057 = vmatprep.mubr.msk.f32.mxu0 %vm349_vm1, %v5712_v3 }
  0x8a   : > { %5007 = vmatprep.mubr.msk.f32.mxu1 %vm349_vm1, %v5546_v33 }
  0x8c   : > { %5058 = vmatmul.mubr.msk.f32.gmra.mxu0 %vm349_vm1, %v5726_v9 }
  0x8d   : > { %5008 = vmatmul.mubr.msk.f32.gmra.mxu1 %vm349_vm1, %v5560_v35  ;;  %5060 = vmatprep.mubr.msk.f32.mxu0 %vm349_vm1, %v5732_v37 }
  0x8e   : > { %5010 = vmatprep.mubr.msk.f32.mxu1 %vm349_vm1, %v5401_v4 }
  0x90   : > { %5061 = vmatmul.mubr.msk.f32.gmra.mxu0 %vm349_vm1, %v5746_v39 }
  0x91   : > { %5011 = vmatmul.mubr.msk.f32.gmra.mxu1 %vm349_vm1, %v5408_v6  ;;  %5063 = vmatprep.mubr.msk.f32.mxu0 %vm349_vm1, %v5752_v5 }
  0x92   : > { %5013 = vmatprep.mubr.msk.f32.mxu1 %vm349_vm1, %v5414_v8 }
  0x94   : > { %5064 = vmatmul.mubr.msk.f32.gmra.mxu0 %vm349_vm1, %v5766_v38 }
  0x95   : > { %5014 = vmatmul.mubr.msk.f32.gmra.mxu1 %vm349_vm1, %v5435_v12  ;;  %5066 = vmatprep.mubr.msk.f32.mxu0 %vm349_vm1, %v5772_v0 }
  0x96   : > { %5016 = vmatprep.mubr.msk.f32.mxu1 %vm349_vm1, %v5445_v14 }
  0x98   : > { %5067 = vmatmul.mubr.msk.f32.gmra.mxu0 %vm349_vm1, %v5786_v2  ;;  %v7019_v2 = vld [vmem:[#allocation24_spill] sm:$0xff] }
  0x99   : > { %5017 = vmatmul.mubr.msk.f32.gmra.mxu1 %vm349_vm1, %v5463_v16  ;;  %5069 = vmatprep.mubr.msk.f32.mxu0 %vm349_vm1, %v5792_v60 }
  0x9a   : > { %5019 = vmatprep.mubr.msk.f32.mxu1 %vm349_vm1, %v5469_v18 }
  0x9c   : > { %5070 = vmatmul.mubr.msk.f32.gmra.mxu0 %vm349_vm1, %v5806_v62 }
  0x9d   : > { %5020 = vmatmul.mubr.msk.f32.gmra.mxu1 %vm349_vm1, %v5483_v20  ;;  %5072 = vmatprep.mubr.msk.f32.mxu0 %vm349_vm1, %v5812_v56  ;;  %v7017_v56 = vld [vmem:[#allocation22_spill] sm:$0xff] }
  0x9e   : > { %5022 = vmatprep.mubr.msk.f32.mxu1 %vm349_vm1, %v5489_v22 }
  0xa0   : > { %5073 = vmatmul.mubr.msk.f32.gmra.mxu0 %vm349_vm1, %v5826_v58 }
  0xa1   : > { %5023 = vmatmul.mubr.msk.f32.gmra.mxu1 %vm349_vm1, %v5503_v24  ;;  %5075 = vmatprep.mubr.msk.f32.mxu0 %vm349_vm1, %v5832_v52 }
  0xa2   : > { %5025 = vmatprep.mubr.msk.f32.mxu1 %vm349_vm1, %v5509_v26 }
  0xa4   : > { %5076 = vmatmul.mubr.msk.f32.gmra.mxu0 %vm349_vm1, %v5846_v54 }
  0xa5   : > { %5026 = vmatmul.mubr.msk.f32.gmra.mxu1 %vm349_vm1, %v5523_v28  ;;  %5078 = vmatprep.mubr.msk.f32.mxu0 %vm349_vm1, %v5852_v48  ;;  %v7001_v48 = vld [vmem:[#allocation6_spill] sm:$0xff] }
  0xa6   : > { %5028 = vmatprep.mubr.msk.f32.mxu1 %vm349_vm1, %v5529_v30 }
  0xa8   : > { %5079 = vmatmul.mubr.msk.f32.gmra.mxu0 %vm349_vm1, %v5866_v50  ;;  %v7015_v50 = vld [vmem:[#allocation20_spill] sm:$0xff] }
  0xa9   : > { %5029 = vmatmul.mubr.msk.f32.gmra.mxu1 %vm349_vm1, %v5543_v32  ;;  %5081 = vmatprep.mubr.msk.f32.mxu0 %vm349_vm1, %v5872_v42  ;;  %v6998_v42 = vld [vmem:[#allocation3_spill] sm:$0xff] }
  0xaa   : > { %5031 = vmatprep.mubr.msk.f32.mxu1 %vm349_vm1, %v5549_v34 }
  0xac   : > { %5082 = vmatmul.mubr.msk.f32.gmra.mxu0 %vm349_vm1, %v5886_v46  ;;  %v7000_v46 = vld [vmem:[#allocation5_spill] sm:$0xff] }
  0xad   : > { %5032 = vmatmul.mubr.msk.f32.gmra.mxu1 %vm349_vm1, %v6996_v41  ;;  %5084 = vmatprep.mubr.msk.f32.mxu0 %vm349_vm1, %v6033_v11 }
  0xae   : > { %5034 = vmatprep.mubr.msk.f32.mxu1 %vm349_vm1, %v6030_v7 }
  0xb0   : > { %5085 = vmatmul.mubr.msk.f32.gmra.mxu0 %vm349_vm1, %v6047_v44  ;;  %v7026_v44 = vld [vmem:[#allocation28_spill] sm:$0xff] }
  0xb1   : > { %5035 = vmatmul.mubr.msk.f32.gmra.mxu1 %vm349_vm1, %v6044_v43  ;;  %5139 = vmatprep.mubr.msk.f32.mxu0 %vm349_vm1, %v5442_v13  ;;  %v7002_v13 = vld [vmem:[#allocation7_spill] sm:$0xff] }
  0xb2   : > { %5089 = vmatprep.mubr.msk.f32.mxu1 %vm349_vm1, %v6998_v42 }
  0xb4   : > { %5140 = vmatmul.mubr.msk.f32.vlgmr.msra.gmra.mxu0 %vm349_vm1, %v5460_v15  ;;  %v7003_v15 = vld [vmem:[#allocation8_spill] sm:$0xff] }
  0xb5   : > { %5090 = vmatmul.mubr.msk.f32.vlgmr.msra.gmra.mxu1 %vm349_vm1, %v6999_v45  ;;  %5238 = vmatpush3.msk.msra.mxu0 %vm446_vm0, %v5911_v10 }
  0xb6   : > { %5188 = vmatpush3.msk.msra.mxu1 %vm446_vm0, %v5906_v36  ;;  %5092 = vmatprep.mubr.msk.f32.mxu1 %vm349_vm1, %v7000_v46  ;;  %v7004_v36 = vld [vmem:[#allocation9_spill] sm:$0xff] }
  0xb7   : > { %5142 = vmatprep.mubr.msk.f32.mxu0 %vm349_vm1, %v5466_v17  ;;  %v7005_v17 = vld [vmem:[#allocation10_spill] sm:$0xff] }
  0xb8   : > { %5143 = vmatmul.mubr.msk.f32.gmra.mxu0 %vm349_vm1, %v5480_v19  ;;  %v7006_v19 = vld [vmem:[#allocation11_spill] sm:$0xff] }
  0xb9   : > { %5093 = vmatmul.mubr.msk.f32.gmra.mxu1 %vm349_vm1, %v7001_v48  ;;  %5145 = vmatprep.mubr.msk.f32.mxu0 %vm349_vm1, %v5486_v21  ;;  %v7007_v21 = vld [vmem:[#allocation12_spill] sm:$0xff] }
  0xba   : > { %5095 = vmatprep.mubr.msk.f32.mxu1 %vm349_vm1, %v7002_v13 }
  0xbc   : > { %5146 = vmatmul.mubr.msk.f32.gmra.mxu0 %vm349_vm1, %v5500_v23  ;;  %v7008_v23 = vld [vmem:[#allocation13_spill] sm:$0xff] }
  0xbd   : > { %5096 = vmatmul.mubr.msk.f32.gmra.mxu1 %vm349_vm1, %v7003_v15  ;;  %5148 = vmatprep.mubr.msk.f32.mxu0 %vm349_vm1, %v5506_v25  ;;  %v7009_v25 = vld [vmem:[#allocation14_spill] sm:$0xff] }
  0xbe   : > { %5098 = vmatprep.mubr.msk.f32.mxu1 %vm349_vm1, %v7004_v36 }
  0xc0   : > { %5149 = vmatmul.mubr.msk.f32.gmra.mxu0 %vm349_vm1, %v5520_v27  ;;  %v7010_v27 = vld [vmem:[#allocation15_spill] sm:$0xff] }
  0xc1   : > { %5099 = vmatmul.mubr.msk.f32.gmra.mxu1 %vm349_vm1, %v7005_v17  ;;  %5151 = vmatprep.mubr.msk.f32.mxu0 %vm349_vm1, %v5526_v29  ;;  %v7011_v29 = vld [vmem:[#allocation16_spill] sm:$0xff] }
  0xc2   : > { %5101 = vmatprep.mubr.msk.f32.mxu1 %vm349_vm1, %v7006_v19 }
  0xc4   : > { %5152 = vmatmul.mubr.msk.f32.gmra.mxu0 %vm349_vm1, %v5540_v31  ;;  %v7012_v31 = vld [vmem:[#allocation17_spill] sm:$0xff] }
  0xc5   : > { %5102 = vmatmul.mubr.msk.f32.gmra.mxu1 %vm349_vm1, %v7007_v21  ;;  %5154 = vmatprep.mubr.msk.f32.mxu0 %vm349_vm1, %v5546_v33  ;;  %v7013_v33 = vld [vmem:[#allocation18_spill] sm:$0xff] }
  0xc6   : > { %5104 = vmatprep.mubr.msk.f32.mxu1 %vm349_vm1, %v7008_v23 }
  0xc8   : > { %5155 = vmatmul.mubr.msk.f32.gmra.mxu0 %vm349_vm1, %v5560_v35  ;;  %v7014_v35 = vld [vmem:[#allocation19_spill] sm:$0xff] }
  0xc9   : > { %5105 = vmatmul.mubr.msk.f32.gmra.mxu1 %vm349_vm1, %v7009_v25  ;;  %5157 = vmatprep.mubr.msk.f32.mxu0 %vm349_vm1, %v5401_v4 }
  0xca   : > { %5107 = vmatprep.mubr.msk.f32.mxu1 %vm349_vm1, %v7010_v27 }
  0xcc   : > { %5158 = vmatmul.mubr.msk.f32.gmra.mxu0 %vm349_vm1, %v5408_v6 }
  0xcd   : > { %5108 = vmatmul.mubr.msk.f32.gmra.mxu1 %vm349_vm1, %v7011_v29  ;;  %5160 = vmatprep.mubr.msk.f32.mxu0 %vm349_vm1, %v5414_v8  ;;  %v7016_v8 = vld [vmem:[#allocation21_spill] sm:$0xff] }
  0xce   : > { %5110 = vmatprep.mubr.msk.f32.mxu1 %vm349_vm1, %v7012_v31 }
  0xd0   : > { %5161 = vmatmul.mubr.msk.f32.gmra.mxu0 %vm349_vm1, %v5435_v12 }
  0xd1   : > { %5111 = vmatmul.mubr.msk.f32.gmra.mxu1 %vm349_vm1, %v7013_v33  ;;  %5163 = vmatprep.mubr.msk.f32.mxu0 %vm349_vm1, %v5445_v14 }
  0xd2   : > { %5113 = vmatprep.mubr.msk.f32.mxu1 %vm349_vm1, %v7014_v35 }
  0xd4   : > { %v6125_v4 = vpop.f32.mrf.mxu0  ;;  %5164 = vmatmul.mubr.msk.f32.gmra.mxu0 %vm349_vm1, %v5463_v16  ;;  %v7018_v16 = vld [vmem:[#allocation23_spill] sm:$0xff] }
  0xd5   : > { %v6127_v6 = vpop.f32.mrf.mxu1  ;;  %5114 = vmatmul.mubr.msk.f32.gmra.mxu1 %vm349_vm1, %v7015_v50  ;;  %5166 = vmatprep.mubr.msk.f32.mxu0 %vm349_vm1, %v5469_v18 }
  0xd6   : > { %5116 = vmatprep.mubr.msk.f32.mxu1 %vm349_vm1, %v7016_v8  ;;  %v6137_v12 = vpop.f32.mrf.mxu0 }
  0xd7   : > { %v6139_v52 = vpop.f32.mrf.mxu1 }
  0xd8   : > { %v6141_v14 = vpop.f32.mrf.mxu0  ;;  %5167 = vmatmul.mubr.msk.f32.gmra.mxu0 %vm349_vm1, %v5483_v20  ;;  %v7020_v20 = vld [vmem:[#allocation25_spill] sm:$0xff] }
  0xd9   : > { %v6143_v54 = vpop.f32.mrf.mxu1  ;;  %5117 = vmatmul.mubr.msk.f32.gmra.mxu1 %vm349_vm1, %v7017_v56  ;;  %5169 = vmatprep.mubr.msk.f32.mxu0 %vm349_vm1, %v5489_v22  ;;  %v7022_v56 = vld [vmem:[#allocation26_spill] sm:$0xff] }
  0xda   : > { %5119 = vmatprep.mubr.msk.f32.mxu1 %vm349_vm1, %v7018_v16  ;;  %v6153_v18 = vpop.f32.mrf.mxu0 }
  0xdb   : > { %v6155_v58 = vpop.f32.mrf.mxu1 }
  0xdc   : > { %v6157_v60 = vpop.f32.mrf.mxu0  ;;  %5170 = vmatmul.mubr.msk.f32.gmra.mxu0 %vm349_vm1, %v5503_v24  ;;  %v7023_v24 = vld [vmem:[#allocation27_spill] sm:$0xff] }
  0xdd   : > { %v6159_v62 = vpop.f32.mrf.mxu1  ;;  %5120 = vmatmul.mubr.msk.f32.gmra.mxu1 %vm349_vm1, %v7019_v2  ;;  %5172 = vmatprep.mubr.msk.f32.mxu0 %vm349_vm1, %v5509_v26 }
  0xde   : > { %5122 = vmatprep.mubr.msk.f32.mxu1 %vm349_vm1, %v7020_v20  ;;  %v6169_v22 = vpop.f32.mrf.mxu0 }
  0xdf   : > { %v6171_v10 = vpop.f32.mrf.mxu1 }
  0xe0   : > { %v6173_v42 = vpop.f32.mrf.mxu0  ;;  %5173 = vmatmul.mubr.msk.f32.gmra.mxu0 %vm349_vm1, %v5523_v28  ;;  %v7027_v28 = vld [vmem:[#allocation29_spill] sm:$0xff] }
  0xe1   : > { %v6175_v45 = vpop.f32.mrf.mxu1  ;;  %5123 = vmatmul.mubr.msk.f32.gmra.mxu1 %vm349_vm1, %v7022_v56  ;;  %5175 = vmatprep.mubr.msk.f32.mxu0 %vm349_vm1, %v5529_v30 }
  0xe2   : > { %7021 = vst [vmem:[#allocation3_spill] sm:$0xff] %v6175_v45  ;;  %5125 = vmatprep.mubr.msk.f32.mxu1 %vm349_vm1, %v7023_v24  ;;  %v6185_v26 = vpop.f32.mrf.mxu0 }
  0xe3   : > { %v6187_v16 = vpop.f32.mrf.mxu1 }
  0xe4   : > { %7024 = vst [vmem:[#allocation4_spill] sm:$0xff] %v6187_v16  ;;  %v6189_v2 = vpop.f32.mrf.mxu0  ;;  %5176 = vmatmul.mubr.msk.f32.gmra.mxu0 %vm349_vm1, %v5543_v32  ;;  %v7030_v32 = vld [vmem:[#allocation30_spill] sm:$0xff] }
  0xe5   : > { %v6191_v20 = vpop.f32.mrf.mxu1  ;;  %5126 = vmatmul.mubr.msk.f32.gmra.mxu1 %vm349_vm1, %v7026_v44  ;;  %5178 = vmatprep.mubr.msk.f32.mxu0 %vm349_vm1, %v5549_v34 }
  0xe6   : > { %7025 = vst [vmem:[#allocation5_spill] sm:$0xff] %v6191_v20  ;;  %5128 = vmatprep.mubr.msk.f32.mxu1 %vm349_vm1, %v7027_v28  ;;  %v6201_v30 = vpop.f32.mrf.mxu0  ;;  %v6222_v28 = vld [vmem:[%s5397_s25 + $0x182] sm:$0xff] }
  0xe7   : > { %v6203_v56 = vpop.f32.mrf.mxu1  ;;  %7032 = vst [vmem:[#allocation9_spill] sm:$0xff] %v6222_v28 }
  0xe8   : > { %7028 = vst [vmem:[#allocation6_spill] sm:$0xff] %v6203_v56  ;;  %v6205_v24 = vpop.f32.mrf.mxu0  ;;  %5179 = vmatmul.mubr.msk.f32.gmra.mxu0 %vm349_vm1, %v6996_v41  ;;  %v4370_v41 = vld [vmem:[%s5397_s25 + $0x1a0] sm:$0xff] }
  0xe9   : > { %v6207_v11 = vpop.f32.mrf.mxu1  ;;  %5129 = vmatmul.mubr.msk.f32.gmra.mxu1 %vm349_vm1, %v5869_v40  ;;  %5181 = vmatprep.mubr.msk.f32.mxu0 %vm349_vm1, %v6030_v7  ;;  %v7034_v40 = vld [vmem:[#allocation31_spill] sm:$0xff] }
  0xea   : > { %7029 = vst [vmem:[#allocation7_spill] sm:$0xff] %v6207_v11  ;;  %5131 = vmatprep.mubr.msk.f32.mxu1 %vm349_vm1, %v7030_v32  ;;  %v6217_v34 = vpop.f32.mrf.mxu0  ;;  %v4369_v11 = vld [vmem:[%s5397_s25 + $0x198] sm:$0xff]  ;;  %v6237_v7 = vld [vmem:[%s5397_s25 + $0x18a] sm:$0xff] }
  0xeb   : > { %v6219_v44 = vpop.f32.mrf.mxu1  ;;  %7035 = vst [vmem:[#allocation11_spill] sm:$0xff] %v6237_v7 }
  0xec   : > { %7031 = vst [vmem:[#allocation8_spill] sm:$0xff] %v6219_v44  ;;  %v6225_v56 = vpop.f32.mrf.mxu0  ;;  %5182 = vmatmul.mubr.msk.f32.gmra.mxu0 %vm349_vm1, %v6044_v43 }
  0xed   : > { %v6227_v20 = vpop.f32.mrf.mxu1  ;;  %5132 = vmatmul.mubr.msk.f32.gmra.mxu1 %vm349_vm1, %v7034_v40  ;;  %5184 = vmatprep.mubr.msk.f32.mxu0 %vm349_vm1, %v4369_v11  ;;  %v6258_v11 = vld [vmem:[%s6911_s2] ss:$0 sm:$0xff] }
  0xee   : > { %7033 = vst [vmem:[#allocation10_spill] sm:$0xff] %v6227_v20  ;;  %5134 = vmatprep.mubr.msk.f32.mxu1 %vm349_vm1, %v6222_v28  ;;  %v6240_v32 = vpop.f32.mrf.mxu0 }
  0xef   : > { %v6242_v44 = vpop.f32.mrf.mxu1 }
  0xf0   : > { %7036 = vst [vmem:[#allocation12_spill] sm:$0xff] %v6242_v44  ;;  %v6244_v16 = vpop.f32.mrf.mxu0  ;;  %5185 = vmatmul.mubr.msk.f32.gmra.mxu0 %vm349_vm1, %v4370_v41 }
  0xf1   : > { %v6246_v20 = vpop.f32.mrf.mxu1  ;;  %5135 = vmatmul.mubr.msk.f32.gmra.mxu1 %vm349_vm1, %v6237_v7  ;;  %5239 = vmatprep.mubr.msk.f32.mxu0 %vm349_vm1, %v7000_v46  ;;  %v678_v7 = vadd.f32 %v6141_v14, %v6258_v11 }
  0xf2   : > { %7037 = vst [vmem:[#allocation13_spill] sm:$0xff] %v6246_v20  ;;  %5189 = vmatprep.mubr.msk.f32.mxu1 %vm349_vm1, %v5608_v47  ;;  %v6260_v43 = vpop.f32.mrf.mxu0  ;;  %v676_v20 = vadd.f32 %v6125_v4, %v6258_v11  ;;  %v675_v47 = vadd.f32 %v6258_v11, %v6137_v12 }
  0xf3   : > { %v6262_v40 = vpop.f32.mrf.mxu1 }
  0xf4   : > { %7038 = vst [vmem:[#allocation14_spill] sm:$0xff] %v6262_v40  ;;  %v4941_v41 = vpop.f32.mrf.mxu0  ;;  %5240 = vmatmul.mubr.msk.f32.vlgmr.msra.gmra.mxu0 %vm349_vm1, %v7001_v48 }
  0xf5   : > { %v4891_v44 = vpop.f32.mrf.mxu1  ;;  %5190 = vmatmul.mubr.msk.f32.vlgmr.msra.gmra.mxu1 %vm349_vm1, %v5626_v49  ;;  %5242 = vmatprep.mubr.msk.f32.mxu0 %vm349_vm1, %v7002_v13 }
  0xf6   : > { %v1066_v46 = vadd.f32 %v4891_v44, %v676_v20  ;;  %5192 = vmatprep.mubr.msk.f32.mxu1 %vm349_vm1, %v5632_v51  ;;  %v1296_v4 = vpop.f32.mrf.mxu0  ;;  %v677_v51 = vadd.f32 %v6258_v11, %v6153_v18 }
  0xf7   : > { %v906_v40 = vpop.f32.mrf.mxu1 }
  0xf8   : > { %v6278_v28 = vadd.f32 %v4941_v41, %v1066_v46  ;;  %v1065_v49 = vadd.f32 %v906_v40, %v675_v47  ;;  %v4944_v48 = vpop.f32.mrf.mxu0  ;;  %5243 = vmatmul.mubr.msk.f32.gmra.mxu0 %vm349_vm1, %v7003_v15 }
  0xf9   : > { %v4894_v45 = vpop.f32.mrf.mxu1  ;;  %5193 = vmatmul.mubr.msk.f32.gmra.mxu1 %vm349_vm1, %v5646_v53  ;;  %5245 = vmatprep.mubr.msk.f32.mxu0 %vm349_vm1, %v7004_v36  ;;  %v680_v53 = vadd.f32 %v6157_v60, %v6258_v11 }
  0xfa   : > { %v6286_v13 = vadd.f32 %v1296_v4, %v1065_v49  ;;  %v1068_v12 = vadd.f32 %v4894_v45, %v678_v7  ;;  %5195 = vmatprep.mubr.msk.f32.mxu1 %vm349_vm1, %v5652_v55  ;;  %v1306_v20 = vpop.f32.mrf.mxu0  ;;  %v679_v55 = vadd.f32 %v6258_v11, %v6169_v22 }
  0xfb   : > { %v916_v14 = vpop.f32.mrf.mxu1 }
  0xfc   : > { %v6294_v44 = vadd.f32 %v4944_v48, %v1068_v12  ;;  %v1067_v15 = vadd.f32 %v916_v14, %v677_v51  ;;  %v4947_v41 = vpop.f32.mrf.mxu0  ;;  %5246 = vmatmul.mubr.msk.f32.gmra.mxu0 %vm349_vm1, %v7005_v17 }
  0xfd   : > { %v4897_v40 = vpop.f32.mrf.mxu1  ;;  %5196 = vmatmul.mubr.msk.f32.gmra.mxu1 %vm349_vm1, %v5666_v57  ;;  %5248 = vmatprep.mubr.msk.f32.mxu0 %vm349_vm1, %v7006_v19  ;;  %v682_v57 = vadd.f32 %v6173_v42, %v6258_v11 }
  0xfe   : > { %v6302_v36 = vadd.f32 %v1306_v20, %v1067_v15  ;;  %v1070_v18 = vadd.f32 %v4897_v40, %v680_v53  ;;  %5198 = vmatprep.mubr.msk.f32.mxu1 %vm349_vm1, %v5672_v59  ;;  %v1316_v45 = vpop.f32.mrf.mxu0  ;;  %v681_v59 = vadd.f32 %v6258_v11, %v6185_v26 }
  0xff   : > { %v926_v60 = vpop.f32.mrf.mxu1 }
 0x100   : > { %v6310_v7 = vadd.f32 %v4947_v41, %v1070_v18  ;;  %v1069_v17 = vadd.f32 %v926_v60, %v679_v55  ;;  %v4950_v46 = vpop.f32.mrf.mxu0  ;;  %5249 = vmatmul.mubr.msk.f32.gmra.mxu0 %vm349_vm1, %v7007_v21 }
 0x101   : > { %v4900_v47 = vpop.f32.mrf.mxu1  ;;  %5199 = vmatmul.mubr.msk.f32.gmra.mxu1 %vm349_vm1, %v5686_v61  ;;  %5251 = vmatprep.mubr.msk.f32.mxu0 %vm349_vm1, %v7008_v23  ;;  %v684_v61 = vadd.f32 %v6189_v2, %v6258_v11 }
 0x102   : > { %v6318_v19 = vadd.f32 %v1316_v45, %v1069_v17  ;;  %v1072_v22 = vadd.f32 %v4900_v47, %v682_v57  ;;  %5201 = vmatprep.mubr.msk.f32.mxu1 %vm349_vm1, %v5692_v63  ;;  %v1326_v4 = vpop.f32.mrf.mxu0  ;;  %v683_v63 = vadd.f32 %v6258_v11, %v6201_v30  ;;  %v4488_v17 = vld [vmem:[%s5397_s25 + $0xfa] sm:$0xff] }
 0x103   : > { %v936_v42 = vpop.f32.mrf.mxu1 }
 0x104   : > { %v6326_v49 = vadd.f32 %v4950_v46, %v1072_v22  ;;  %v1071_v21 = vadd.f32 %v936_v42, %v681_v59  ;;  %v4953_v51 = vpop.f32.mrf.mxu0  ;;  %5252 = vmatmul.mubr.msk.f32.gmra.mxu0 %vm349_vm1, %v7009_v25  ;;  %v4423_v46 = vld [vmem:[%s5397_s25 + $0x109] sm:$0xff] }
 0x105   : > { %v4903_v48 = vpop.f32.mrf.mxu1  ;;  %5202 = vmatmul.mubr.msk.f32.gmra.mxu1 %vm349_vm1, %v5706_v1  ;;  %5254 = vmatprep.mubr.msk.f32.mxu0 %vm349_vm1, %v7010_v27  ;;  %v686_v1 = vadd.f32 %v6205_v24, %v6258_v11 }
 0x106   : > { %v6334_v23 = vadd.f32 %v1326_v4, %v1071_v21  ;;  %v1074_v26 = vadd.f32 %v4903_v48, %v684_v61  ;;  %5204 = vmatprep.mubr.msk.f32.mxu1 %vm349_vm1, %v5712_v3  ;;  %v1336_v12 = vpop.f32.mrf.mxu0  ;;  %v685_v3 = vadd.f32 %v6258_v11, %v6217_v34  ;;  %v4490_v21 = vld [vmem:[%s5397_s25 + $0x112] sm:$0xff] }
 0x107   : > { %v946_v2 = vpop.f32.mrf.mxu1 }
 0x108   : > { %v6342_v14 = vadd.f32 %v4953_v51, %v1074_v26  ;;  %v1073_v25 = vadd.f32 %v946_v2, %v683_v63  ;;  %v4956_v53 = vpop.f32.mrf.mxu0  ;;  %5255 = vmatmul.mubr.msk.f32.gmra.mxu0 %vm349_vm1, %v7011_v29  ;;  %v4425_v63 = vld [vmem:[%s5397_s25 + $0x121] sm:$0xff]  ;;  %v694_v2 = vadd.f32 %v6143_v54, %v6258_v11  ;;  %v4426_v54 = vld [vmem:[%s5397_s25 + $0x129] sm:$0xff] }
 0x109   : > { %v4906_v20 = vpop.f32.mrf.mxu1  ;;  %5205 = vmatmul.mubr.msk.f32.gmra.mxu1 %vm349_vm1, %v5726_v9  ;;  %5257 = vmatprep.mubr.msk.f32.mxu0 %vm349_vm1, %v7012_v31  ;;  %v688_v9 = vadd.f32 %v6225_v56, %v6258_v11  ;;  %v4491_v26 = vld [vmem:[%s5397_s25 + $0x122] sm:$0xff] }
 0x10a   : > { %v6350_v27 = vadd.f32 %v1336_v12, %v1073_v25  ;;  %v1076_v30 = vadd.f32 %v4906_v20, %v686_v1  ;;  %5207 = vmatprep.mubr.msk.f32.mxu1 %vm349_vm1, %v5732_v37  ;;  %v1346_v15 = vpop.f32.mrf.mxu0  ;;  %v687_v37 = vadd.f32 %v6258_v11, %v6240_v32  ;;  %v693_v20 = vadd.f32 %v6258_v11, %v6155_v58 }
 0x10b   : > { %v956_v24 = vpop.f32.mrf.mxu1 }
 0x10c   : > { %v6358_v40 = vadd.f32 %v4956_v53, %v1076_v30  ;;  %v1075_v29 = vadd.f32 %v956_v24, %v685_v3  ;;  %v4959_v55 = vpop.f32.mrf.mxu0  ;;  %5258 = vmatmul.mubr.msk.f32.gmra.mxu0 %vm349_vm1, %v7013_v33  ;;  %v4492_v30 = vld [vmem:[%s5397_s25 + $0x12a] sm:$0xff] }
 0x10d   : > { %v4909_v41 = vpop.f32.mrf.mxu1  ;;  %5208 = vmatmul.mubr.msk.f32.gmra.mxu1 %vm349_vm1, %v5746_v39  ;;  %5260 = vmatprep.mubr.msk.f32.mxu0 %vm349_vm1, %v7014_v35  ;;  %v690_v39 = vadd.f32 %v6244_v16, %v6258_v11  ;;  %v4422_v16 = vld [vmem:[%s5397_s25 + $0xf9] sm:$0xff] }
 0x10e   : > { %v6366_v31 = vadd.f32 %v1346_v15, %v1075_v29  ;;  %v1078_v34 = vadd.f32 %v4909_v41, %v688_v9  ;;  %5210 = vmatprep.mubr.msk.f32.mxu1 %vm349_vm1, %v5752_v5  ;;  %v1356_v18 = vpop.f32.mrf.mxu0  ;;  %v689_v5 = vadd.f32 %v6258_v11, %v6260_v43  ;;  %v692_v43 = vadd.f32 %v6127_v6, %v6258_v11  ;;  %v4424_v6 = vld [vmem:[%s5397_s25 + $0x111] sm:$0xff]  ;;  %v4427_v9 = vld [vmem:[%s5397_s25 + $0x139] sm:$0xff] }
 0x10f   : > { %v966_v56 = vpop.f32.mrf.mxu1  ;;  %v4493_v29 = vld [vmem:[%s5397_s25 + $0x13a] sm:$0xff]  ;;  %v696_v41 = vadd.f32 %v6159_v62, %v6258_v11 }
 0x110   : > { %v6374_v33 = vadd.f32 %v4959_v55, %v1078_v34  ;;  %v1077_v32 = vadd.f32 %v966_v56, %v687_v37  ;;  %v4962_v45 = vpop.f32.mrf.mxu0  ;;  %5261 = vmatmul.mubr.msk.f32.gmra.mxu0 %vm349_vm1, %v7015_v50  ;;  %v4489_v50 = vld [vmem:[%s5397_s25 + $0x10a] sm:$0xff]  ;;  %v695_v56 = vadd.f32 %v6258_v11, %v6171_v10  ;;  %v4428_v62 = vld [vmem:[%s5397_s25 + $0x141] sm:$0xff] }
 0x111   : > { %v4912_v60 = vpop.f32.mrf.mxu1  ;;  %5211 = vmatmul.mubr.msk.f32.gmra.mxu1 %vm349_vm1, %v5766_v38  ;;  %5263 = vmatprep.mubr.msk.f32.mxu0 %vm349_vm1, %v7016_v8  ;;  %v691_v8 = vadd.f32 %v6258_v11, %v6139_v52 }
 0x112   : > { %v6382_v35 = vadd.f32 %v1356_v18, %v1077_v32  ;;  %v1080_v57 = vadd.f32 %v4912_v60, %v690_v39  ;;  %5213 = vmatprep.mubr.msk.f32.mxu1 %vm349_vm1, %v5772_v0  ;;  %v1366_v38 = vpop.f32.mrf.mxu0  ;;  %v4494_v32 = vld [vmem:[%s5397_s25 + $0x142] sm:$0xff] }
 0x113   : > { %v976_v47 = vpop.f32.mrf.mxu1 }
 0x114   : > { %v6394_v59 = vadd.f32 %v4962_v45, %v1080_v57  ;;  %v1079_v22 = vadd.f32 %v976_v47, %v689_v5  ;;  %v4965_v42 = vpop.f32.mrf.mxu0  ;;  %5264 = vmatmul.mubr.msk.f32.gmra.mxu0 %vm349_vm1, %v4488_v17  ;;  %v4429_v5 = vld [vmem:[%s5397_s25 + $0x151] sm:$0xff] }
 0x115   : > { %v4915_v0 = vpop.f32.mrf.mxu1  ;;  %5214 = vmatmul.mubr.msk.f32.gmra.mxu1 %vm349_vm1, %v4422_v16  ;;  %5266 = vmatprep.mubr.msk.f32.mxu0 %vm349_vm1, %v4489_v50  ;;  %v4495_v57 = vld [vmem:[%s5397_s25 + $0x152] sm:$0xff]  ;;  %v7039_v16 = vld [vmem:[#allocation3_spill] sm:$0xff] }
 0x116   : > { %v6400_v4 = vadd.f32 %v1366_v38, %v1079_v22  ;;  %v1082_v61 = vadd.f32 %v4915_v0, %v692_v43  ;;  %5216 = vmatprep.mubr.msk.f32.mxu1 %vm349_vm1, %v4423_v46  ;;  %v1376_v51 = vpop.f32.mrf.mxu0  ;;  %v698_v17 = vadd.f32 %v7039_v16, %v6258_v11  ;;  %v7040_v50 = vld [vmem:[#allocation4_spill] sm:$0xff] }
 0x117   : > { %v986_v48 = vpop.f32.mrf.mxu1  ;;  %v697_v43 = vadd.f32 %v6258_v11, %v7040_v50 }
 0x118   : > { %v6410_v52 = vadd.f32 %v4965_v42, %v1082_v61  ;;  %v1081_v12 = vadd.f32 %v986_v48, %v691_v8  ;;  %v4968_v25 = vpop.f32.mrf.mxu0  ;;  %5267 = vmatmul.mubr.msk.f32.gmra.mxu0 %vm349_vm1, %v4490_v21  ;;  %v4430_v42 = vld [vmem:[%s5397_s25 + $0x159] sm:$0xff]  ;;  %v4431_v21 = vld [vmem:[%s5397_s25 + $0x169] sm:$0xff] }
 0x119   : > { %v4918_v1 = vpop.f32.mrf.mxu1  ;;  %5217 = vmatmul.mubr.msk.f32.gmra.mxu1 %vm349_vm1, %v4424_v6  ;;  %5269 = vmatprep.mubr.msk.f32.mxu0 %vm349_vm1, %v4491_v26  ;;  %v4496_v8 = vld [vmem:[%s5397_s25 + $0x15a] sm:$0xff]  ;;  %v4497_v48 = vld [vmem:[%s5397_s25 + $0x16a] sm:$0xff] }
 0x11a   : > { %v6416_v53 = vadd.f32 %v1376_v51, %v1081_v12  ;;  %v1084_v3 = vadd.f32 %v4918_v1, %v694_v2  ;;  %5219 = vmatprep.mubr.msk.f32.mxu1 %vm349_vm1, %v4425_v63  ;;  %v1386_v15 = vpop.f32.mrf.mxu0  ;;  %v7041_v51 = vld [vmem:[#allocation5_spill] sm:$0xff] }
 0x11b   : > { %v996_v24 = vpop.f32.mrf.mxu1  ;;  %v700_v63 = vadd.f32 %v7041_v51, %v6258_v11 }
 0x11c   : > { %v6426_v58 = vadd.f32 %v4968_v25, %v1084_v3  ;;  %v1083_v55 = vadd.f32 %v996_v24, %v693_v20  ;;  %v4971_v34 = vpop.f32.mrf.mxu0  ;;  %5270 = vmatmul.mubr.msk.f32.gmra.mxu0 %vm349_vm1, %v4492_v30  ;;  %v7042_v25 = vld [vmem:[#allocation6_spill] sm:$0xff]  ;;  %v4432_v30 = vld [vmem:[%s5397_s25 + $0x171] sm:$0xff] }
 0x11d   : > { %v4921_v37 = vpop.f32.mrf.mxu1  ;;  %5220 = vmatmul.mubr.msk.f32.gmra.mxu1 %vm349_vm1, %v4426_v54  ;;  %5272 = vmatprep.mubr.msk.f32.mxu0 %vm349_vm1, %v4493_v29  ;;  %v699_v20 = vadd.f32 %v6258_v11, %v7042_v25  ;;  %v4498_v24 = vld [vmem:[%s5397_s25 + $0x172] sm:$0xff]  ;;  %v7043_v29 = vld [vmem:[#allocation7_spill] sm:$0xff] }
 0x11e   : > { %v6432_v18 = vadd.f32 %v1386_v15, %v1083_v55  ;;  %v1086_v39 = vadd.f32 %v4921_v37, %v696_v41  ;;  %5222 = vmatprep.mubr.msk.f32.mxu1 %vm349_vm1, %v4427_v9  ;;  %v1396_v45 = vpop.f32.mrf.mxu0  ;;  %v702_v41 = vadd.f32 %v7043_v29, %v6258_v11  ;;  %v7051_v25 = vld [vmem:[#allocation13_spill] sm:$0xff] }
 0x11f   : > { %v1006_v60 = vpop.f32.mrf.mxu1 }
 0x120   : > { %v6442_v10 = vadd.f32 %v4971_v34, %v1086_v39  ;;  %v1085_v47 = vadd.f32 %v1006_v60, %v695_v56  ;;  %v4974_v46 = vpop.f32.mrf.mxu0  ;;  %5273 = vmatmul.mubr.msk.f32.gmra.mxu0 %vm349_vm1, %v4494_v32  ;;  %v7044_v39 = vld [vmem:[#allocation8_spill] sm:$0xff] }
 0x121   : > { %v4924_v38 = vpop.f32.mrf.mxu1  ;;  %5223 = vmatmul.mubr.msk.f32.gmra.mxu1 %vm349_vm1, %v4428_v62  ;;  %5275 = vmatprep.mubr.msk.f32.mxu0 %vm349_vm1, %v4495_v57  ;;  %v701_v62 = vadd.f32 %v6258_v11, %v7044_v39 }
 0x122   : > { %v6448_v22 = vadd.f32 %v1396_v45, %v1085_v47  ;;  %v1088_v0 = vadd.f32 %v4924_v38, %v698_v17  ;;  %5225 = vmatprep.mubr.msk.f32.mxu1 %vm349_vm1, %v4429_v5  ;;  %v1406_v6 = vpop.f32.mrf.mxu0  ;;  %v7045_v45 = vld [vmem:[#allocation32_spill] sm:$0xff]  ;;  %v7046_v5 = vld [vmem:[#allocation9_spill] sm:$0xff]  ;;  %v7047_v38 = vld [vmem:[#allocation10_spill] sm:$0xff] }
 0x123   : > { %v1016_v61 = vpop.f32.mrf.mxu1  ;;  %v4435_v17 = vld [vmem:[%s5397_s25 + $0x199] sm:$0xff] }
 0x124   : > { %v6458_v26 = vadd.f32 %v4974_v46, %v1088_v0  ;;  %v1087_v2 = vadd.f32 %v1016_v61, %v697_v43  ;;  %v4977_v1 = vpop.f32.mrf.mxu0  ;;  %5276 = vmatmul.mubr.msk.f32.gmra.mxu0 %vm349_vm1, %v4496_v8  ;;  %v4501_v47 = vld [vmem:[%s5397_s25 + $0x19a] sm:$0xff]  ;;  %v704_v46 = vadd.f32 %v7047_v38, %v6258_v11  ;;  %v7049_v61 = vld [vmem:[#allocation11_spill] sm:$0xff] }
 0x125   : > { %v4927_v12 = vpop.f32.mrf.mxu1  ;;  %5226 = vmatmul.mubr.msk.f32.gmra.mxu1 %vm349_vm1, %v4430_v42  ;;  %5278 = vmatprep.mubr.msk.f32.mxu0 %vm349_vm1, %v4497_v48  ;;  %v7048_v8 = vld [vmem:[#allocation2_spill] sm:$0xff] }
 0x126   : > { %v6464_v3 = vadd.f32 %v1406_v6, %v1087_v2  ;;  %v1090_v54 = vadd.f32 %v4927_v12, %v700_v63  ;;  %5228 = vmatprep.mubr.msk.f32.mxu1 %vm349_vm1, %v4431_v21  ;;  %v1416_v9 = vpop.f32.mrf.mxu0  ;;  %v7050_v6 = vld [vmem:[#allocation12_spill] sm:$0xff]  ;;  %v4436_v63 = vld [vmem:[%s5397_s25 + $0x1a1] sm:$0xff] }
 0x127   : > { %v1026_v15 = vpop.f32.mrf.mxu1  ;;  %v703_v21 = vadd.f32 %v6258_v11, %v7050_v6  ;;  %v4502_v2 = vld [vmem:[%s5397_s25 + $0x1a2] sm:$0xff] }
 0x128   : > { %v6472_v55 = vadd.f32 %v4977_v1, %v1090_v54  ;;  %v1089_v37 = vadd.f32 %v1026_v15, %v699_v20  ;;  %v4980_v56 = vpop.f32.mrf.mxu0  ;;  %5279 = vmatmul.mubr.msk.f32.gmra.mxu0 %vm349_vm1, %v4498_v24  ;;  %v706_v20 = vadd.f32 %v7051_v25, %v6258_v11 }
 0x129   : > { %v4930_v34 = vpop.f32.mrf.mxu1  ;;  %5229 = vmatmul.mubr.msk.f32.gmra.mxu1 %vm349_vm1, %v4432_v30  ;;  %5281 = vmatprep.mubr.msk.f32.mxu0 %vm349_vm1, %v7046_v5 }
 0x12a   : > { %v6478_v32 = vadd.f32 %v1416_v9, %v1089_v37  ;;  %v1092_v60 = vadd.f32 %v4930_v34, %v702_v41  ;;  %5231 = vmatprep.mubr.msk.f32.mxu1 %vm349_vm1, %v7045_v45  ;;  %v1426_v16 = vpop.f32.mrf.mxu0  ;;  %v7052_v9 = vld [vmem:[#allocation14_spill] sm:$0xff] }
 0x12b   : > { %v1036_v57 = vpop.f32.mrf.mxu1  ;;  %v705_v29 = vadd.f32 %v6258_v11, %v7052_v9 }
 0x12c   : > { %v6488_v50 = vadd.f32 %v4980_v56, %v1092_v60  ;;  %v1091_v43 = vadd.f32 %v1036_v57, %v701_v62  ;;  %v4983_v42 = vpop.f32.mrf.mxu0  ;;  %5282 = vmatmul.mubr.msk.f32.gmra.mxu0 %vm349_vm1, %v7049_v61 }
 0x12d   : > { %v4933_v0 = vpop.f32.mrf.mxu1  ;;  %5232 = vmatmul.mubr.msk.f32.gmra.mxu1 %vm349_vm1, %v7048_v8  ;;  %5284 = vmatprep.mubr.msk.f32.mxu0 %vm349_vm1, %v4501_v47 }
 0x12e   : > { %v6496_v48 = vadd.f32 %v1426_v16, %v1091_v43  ;;  %v1094_v51 = vadd.f32 %v4933_v0, %v704_v46  ;;  %5234 = vmatprep.mubr.msk.f32.mxu1 %vm349_vm1, %v4435_v17  ;;  %v1436_v1 = vpop.f32.mrf.mxu0 }
 0x12f   : > { %v1046_v12 = vpop.f32.mrf.mxu1 }
 0x130   : > { %v6504_v54 = vadd.f32 %v4983_v42, %v1094_v51  ;;  %v1093_v30 = vadd.f32 %v1046_v12, %v703_v21  ;;  %v4986_v15 = vpop.f32.mrf.mxu0  ;;  %5285 = vmatmul.mubr.msk.f32.gmra.mxu0 %vm349_vm1, %v4502_v2 }
 0x131   : > { %v4936_v24 = vpop.f32.mrf.mxu1  ;;  %5235 = vmatmul.mubr.msk.f32.gmra.mxu1 %vm349_vm1, %v4436_v63 }
 0x132   : > { %v6510_v41 = vadd.f32 %v1436_v1, %v1093_v30  ;;  %v1096_v37 = vadd.f32 %v4936_v24, %v706_v20  ;;  %v1446_v56 = vpop.f32.mrf.mxu0 }
 0x133   : > { %v1056_v34 = vpop.f32.mrf.mxu1 }
 0x134   : > { %v6512_v39 = vadd.f32 %v4986_v15, %v1096_v37  ;;  %v1095_v62 = vadd.f32 %v1056_v34, %v705_v29  ;;  %v5041_v45 = vpop.f32.mrf.mxu0 }
 0x135   : > { %v4991_v60 = vpop.f32.mrf.mxu1 }
 0x136   : > { %v6514_v5 = vadd.f32 %v1446_v56, %v1095_v62  ;;  %v1847_v57 = vadd.f32 %v4991_v60, %v6278_v28  ;;  %v2077_v17 = vpop.f32.mrf.mxu0 }
 0x137   : > { %v1687_v16 = vpop.f32.mrf.mxu1 }
 0x138   : > { %v6517_v47 = vadd.f32 %v5041_v45, %v1847_v57  ;;  %v1846_v11 = vadd.f32 %v1687_v16, %v6286_v13  ;;  %v5044_v46 = vpop.f32.mrf.mxu0 }
 0x139   : > { %v4994_v38 = vpop.f32.mrf.mxu1 }
 0x13a   : > { %v6520_v43 = vadd.f32 %v2077_v17, %v1846_v11  ;;  %v1849_v0 = vadd.f32 %v4994_v38, %v6294_v44  ;;  %v2087_v8 = vpop.f32.mrf.mxu0 }
 0x13b   : > { %v1697_v42 = vpop.f32.mrf.mxu1 }
 0x13c   : > { %v6523_v61 = vadd.f32 %v5044_v46, %v1849_v0  ;;  %v1848_v6 = vadd.f32 %v1697_v42, %v6302_v36  ;;  %v5047_v28 = vpop.f32.mrf.mxu0 }
 0x13d   : > { %v4997_v21 = vpop.f32.mrf.mxu1 }
 0x13e   : > { %v6526_v51 = vadd.f32 %v2087_v8, %v1848_v6  ;;  %v1851_v63 = vadd.f32 %v4997_v21, %v6310_v7  ;;  %v2097_v13 = vpop.f32.mrf.mxu0 }
 0x13f   : > { %v1707_v2 = vpop.f32.mrf.mxu1 }
 0x140   : > { %v6529_v12 = vadd.f32 %v5047_v28, %v1851_v63  ;;  %v1850_v1 = vadd.f32 %v1707_v2, %v6318_v19  ;;  %v5050_v44 = vpop.f32.mrf.mxu0 }
 0x141   : > { %v5000_v25 = vpop.f32.mrf.mxu1 }
 0x142   : > { %v6532_v20 = vadd.f32 %v2097_v13, %v1850_v1  ;;  %v1853_v30 = vadd.f32 %v5000_v25, %v6326_v49  ;;  %v2107_v36 = vpop.f32.mrf.mxu0 }
 0x143   : > { %v1717_v24 = vpop.f32.mrf.mxu1 }
 0x144   : > { %v6535_v15 = vadd.f32 %v5050_v44, %v1853_v30  ;;  %v1852_v9 = vadd.f32 %v1717_v24, %v6334_v23  ;;  %v5053_v7 = vpop.f32.mrf.mxu0 }
 0x145   : > { %v5003_v29 = vpop.f32.mrf.mxu1 }
 0x146   : > { %v6538_v37 = vadd.f32 %v2107_v36, %v1852_v9  ;;  %v1855_v34 = vadd.f32 %v5003_v29, %v6342_v14  ;;  %v2117_v19 = vpop.f32.mrf.mxu0 }
 0x147   : > { %v1727_v56 = vpop.f32.mrf.mxu1 }
 0x148   : > { %v6541_v62 = vadd.f32 %v5053_v7, %v1855_v34  ;;  %v1854_v60 = vadd.f32 %v1727_v56, %v6350_v27  ;;  %v5056_v49 = vpop.f32.mrf.mxu0 }
 0x149   : > { %v5006_v45 = vpop.f32.mrf.mxu1 }
 0x14a   : > { %v6544_v57 = vadd.f32 %v2117_v19, %v1854_v60  ;;  %v1857_v16 = vadd.f32 %v5006_v45, %v6358_v40  ;;  %v2127_v23 = vpop.f32.mrf.mxu0 }
 0x14b   : > { %v1737_v17 = vpop.f32.mrf.mxu1 }
 0x14c   : > { %v6547_v11 = vadd.f32 %v5056_v49, %v1857_v16  ;;  %v1856_v38 = vadd.f32 %v1737_v17, %v6366_v31  ;;  %v5059_v14 = vpop.f32.mrf.mxu0 }
 0x14d   : > { %v5009_v46 = vpop.f32.mrf.mxu1 }
 0x14e   : > { %v6550_v0 = vadd.f32 %v2127_v23, %v1856_v38  ;;  %v1859_v42 = vadd.f32 %v5009_v46, %v6374_v33  ;;  %v2137_v27 = vpop.f32.mrf.mxu0 }
 0x14f   : > { %v1747_v8 = vpop.f32.mrf.mxu1 }
 0x150   : > { %v6553_v6 = vadd.f32 %v5059_v14, %v1859_v42  ;;  %v1858_v21 = vadd.f32 %v1747_v8, %v6382_v35  ;;  %v5062_v40 = vpop.f32.mrf.mxu0 }
 0x151   : > { %v5012_v28 = vpop.f32.mrf.mxu1 }
 0x152   : > { %v6556_v63 = vadd.f32 %v2137_v27, %v1858_v21  ;;  %v1861_v2 = vadd.f32 %v5012_v28, %v6394_v59  ;;  %v2147_v31 = vpop.f32.mrf.mxu0 }
 0x153   : > { %v1757_v13 = vpop.f32.mrf.mxu1 }
 0x154   : > { %v6559_v1 = vadd.f32 %v5062_v40, %v1861_v2  ;;  %v1860_v25 = vadd.f32 %v1757_v13, %v6400_v4  ;;  %v5065_v33 = vpop.f32.mrf.mxu0 }
 0x155   : > { %v5015_v44 = vpop.f32.mrf.mxu1 }
 0x156   : > { %v6562_v30 = vadd.f32 %v2147_v31, %v1860_v25  ;;  %v1863_v24 = vadd.f32 %v5015_v44, %v6410_v52  ;;  %v2157_v35 = vpop.f32.mrf.mxu0 }
 0x157   : > { %v1767_v36 = vpop.f32.mrf.mxu1 }
 0x158   : > { %v6565_v9 = vadd.f32 %v5065_v33, %v1863_v24  ;;  %v1862_v29 = vadd.f32 %v1767_v36, %v6416_v53  ;;  %v5068_v59 = vpop.f32.mrf.mxu0 }
 0x159   : > { %v5018_v7 = vpop.f32.mrf.mxu1 }
 0x15a   : > { %v6568_v34 = vadd.f32 %v2157_v35, %v1862_v29  ;;  %v1865_v56 = vadd.f32 %v5018_v7, %v6426_v58  ;;  %v2167_v4 = vpop.f32.mrf.mxu0 }
 0x15b   : > { %v1777_v19 = vpop.f32.mrf.mxu1 }
 0x15c   : > { %v6571_v60 = vadd.f32 %v5068_v59, %v1865_v56  ;;  %v1864_v45 = vadd.f32 %v1777_v19, %v6432_v18  ;;  %v5071_v52 = vpop.f32.mrf.mxu0 }
 0x15d   : > { %v5021_v49 = vpop.f32.mrf.mxu1 }
 0x15e   : > { %7053 = vst [vmem:[#allocation15_spill] sm:$0xff] %v6571_v60  ;;  %v6574_v16 = vadd.f32 %v2167_v4, %v1864_v45  ;;  %v1867_v17 = vadd.f32 %v5021_v49, %v6442_v10  ;;  %v2177_v53 = vpop.f32.mrf.mxu0 }
 0x15f   : > { %v1787_v23 = vpop.f32.mrf.mxu1 }
 0x160   : > { %7054 = vst [vmem:[#allocation16_spill] sm:$0xff] %v6574_v16  ;;  %v6577_v38 = vadd.f32 %v5071_v52, %v1867_v17  ;;  %v1866_v46 = vadd.f32 %v1787_v23, %v6448_v22  ;;  %v5074_v58 = vpop.f32.mrf.mxu0 }
 0x161   : > { %v5024_v14 = vpop.f32.mrf.mxu1 }
 0x162   : > { %7055 = vst [vmem:[#allocation17_spill] sm:$0xff] %v6577_v38  ;;  %v6580_v42 = vadd.f32 %v2177_v53, %v1866_v46  ;;  %v1869_v8 = vadd.f32 %v5024_v14, %v6458_v26  ;;  %v2187_v18 = vpop.f32.mrf.mxu0 }
 0x163   : > { %v1797_v27 = vpop.f32.mrf.mxu1 }
 0x164   : > { %7056 = vst [vmem:[#allocation18_spill] sm:$0xff] %v6580_v42  ;;  %v6583_v21 = vadd.f32 %v5074_v58, %v1869_v8  ;;  %v1868_v28 = vadd.f32 %v1797_v27, %v6464_v3  ;;  %v5077_v10 = vpop.f32.mrf.mxu0 }
 0x165   : > { %v5027_v40 = vpop.f32.mrf.mxu1 }
 0x166   : > { %7057 = vst [vmem:[#allocation19_spill] sm:$0xff] %v6583_v21  ;;  %v6586_v2 = vadd.f32 %v2187_v18, %v1868_v28  ;;  %v1871_v13 = vadd.f32 %v5027_v40, %v6472_v55  ;;  %v2197_v22 = vpop.f32.mrf.mxu0 }
 0x167   : > { %v1807_v31 = vpop.f32.mrf.mxu1 }
 0x168   : > { %7058 = vst [vmem:[#allocation20_spill] sm:$0xff] %v6586_v2  ;;  %v6589_v25 = vadd.f32 %v5077_v10, %v1871_v13  ;;  %v1870_v44 = vadd.f32 %v1807_v31, %v6478_v32  ;;  %v5080_v26 = vpop.f32.mrf.mxu0 }
 0x169   : > { %v5030_v33 = vpop.f32.mrf.mxu1 }
 0x16a   : > { %7059 = vst [vmem:[#allocation21_spill] sm:$0xff] %v6589_v25  ;;  %v6592_v24 = vadd.f32 %v2197_v22, %v1870_v44  ;;  %v1873_v36 = vadd.f32 %v5030_v33, %v6488_v50  ;;  %v2207_v3 = vpop.f32.mrf.mxu0 }
 0x16b   : > { %v1817_v35 = vpop.f32.mrf.mxu1 }
 0x16c   : > { %7060 = vst [vmem:[#allocation22_spill] sm:$0xff] %v6592_v24  ;;  %v6595_v29 = vadd.f32 %v5080_v26, %v1873_v36  ;;  %v1872_v7 = vadd.f32 %v1817_v35, %v6496_v48  ;;  %v5083_v55 = vpop.f32.mrf.mxu0 }
 0x16d   : > { %v5033_v59 = vpop.f32.mrf.mxu1 }
 0x16e   : > { %7061 = vst [vmem:[#allocation23_spill] sm:$0xff] %v6595_v29  ;;  %v6598_v56 = vadd.f32 %v2207_v3, %v1872_v7  ;;  %v1875_v19 = vadd.f32 %v5033_v59, %v6504_v54  ;;  %v2217_v32 = vpop.f32.mrf.mxu0 }
 0x16f   : > { %v1827_v4 = vpop.f32.mrf.mxu1 }
 0x170   : > { %7062 = vst [vmem:[#allocation24_spill] sm:$0xff] %v6598_v56  ;;  %v6601_v45 = vadd.f32 %v5083_v55, %v1875_v19  ;;  %v1874_v49 = vadd.f32 %v1827_v4, %v6510_v41  ;;  %v5086_v50 = vpop.f32.mrf.mxu0 }
 0x171   : > { %v5036_v52 = vpop.f32.mrf.mxu1 }
 0x172   : > { %7063 = vst [vmem:[#allocation25_spill] sm:$0xff] %v6601_v45  ;;  %v6604_v17 = vadd.f32 %v2217_v32, %v1874_v49  ;;  %v1877_v23 = vadd.f32 %v5036_v52, %v6512_v39  ;;  %v2227_v48 = vpop.f32.mrf.mxu0 }
 0x173   : > { %v1837_v53 = vpop.f32.mrf.mxu1 }
 0x174   : > { %7064 = vst [vmem:[#allocation26_spill] sm:$0xff] %v6604_v17  ;;  %v6607_v46 = vadd.f32 %v5086_v50, %v1877_v23  ;;  %v1876_v14 = vadd.f32 %v1837_v53, %v6514_v5  ;;  %v6610_v54 = vpop.f32.mrf.mxu0 }
 0x175   : > { %v5091_v58 = vpop.f32.mrf.mxu1 }
 0x176   : > { %7065 = vst [vmem:[#allocation27_spill] sm:$0xff] %v6607_v46  ;;  %v6612_v8 = vadd.f32 %v2227_v48, %v1876_v14  ;;  %v6614_v18 = vpop.f32.mrf.mxu0 }
 0x177   : > { %v2467_v27 = vpop.f32.mrf.mxu1 }
 0x178   : > { %7066 = vst [vmem:[#allocation28_spill] sm:$0xff] %v6612_v8  ;;  %v6618_v28 = vpop.f32.mrf.mxu0 }
 0x179   : > { %v6616_v41 = vpop.f32.mrf.mxu1 }
 0x17a   : > { %v6622_v39 = vpop.f32.mrf.mxu0 }
 0x17b   : > { %v6620_v40 = vpop.f32.mrf.mxu1 }
 0x17c   : > { %v6626_v13 = vpop.f32.mrf.mxu0 }
 0x17d   : > { %v6624_v10 = vpop.f32.mrf.mxu1 }
 0x17e   : > { %v6630_v31 = vpop.f32.mrf.mxu0 }
 0x17f   : > { %v6628_v5 = vpop.f32.mrf.mxu1 }
 0x180   : > { %v6634_v44 = vpop.f32.mrf.mxu0 }
 0x181   : > { %v6632_v22 = vpop.f32.mrf.mxu1 }
 0x182   : > { %v6638_v26 = vpop.f32.mrf.mxu0 }
 0x183   : > { %v6636_v33 = vpop.f32.mrf.mxu1 }
 0x184   : > { %v6642_v35 = vpop.f32.mrf.mxu0 }
 0x185   : > { %v6640_v36 = vpop.f32.mrf.mxu1 }
 0x186   : > { %v6646_v7 = vpop.f32.mrf.mxu0 }
 0x187   : > { %v6644_v3 = vpop.f32.mrf.mxu1 }
 0x188   : > { %v6650_v55 = vpop.f32.mrf.mxu0 }
 0x189   : > { %v6648_v59 = vpop.f32.mrf.mxu1 }
 0x18a   : > { %v6654_v4 = vpop.f32.mrf.mxu0 }
 0x18b   : > { %v6652_v19 = vpop.f32.mrf.mxu1 }
 0x18c   : > { %v6658_v49 = vpop.f32.mrf.mxu0 }
 0x18d   : > { %v6656_v32 = vpop.f32.mrf.mxu1 }
 0x18e   : > { %v6662_v50 = vpop.f32.mrf.mxu0 }
 0x18f   : > { %v6660_v52 = vpop.f32.mrf.mxu1 }
 0x190   : > { %v6666_v53 = vpop.f32.mrf.mxu0 }
 0x191   : > { %v6664_v23 = vpop.f32.mrf.mxu1 }
 0x192   : > { %v6670_v14 = vpop.f32.mrf.mxu0 }
 0x193   : > { %v6668_v48 = vpop.f32.mrf.mxu1 }
 0x194   : > { %v6674_v46 = vpop.f32.mrf.mxu0 }
 0x195   : > { %v6672_v8 = vpop.f32.mrf.mxu1 }
 0x196   : > { %v6678_v45 = vpop.f32.mrf.mxu0 }
 0x197   : > { %v6676_v17 = vpop.f32.mrf.mxu1  ;;  %7067 = vst [vmem:[#allocation29_spill] sm:$0xff] %v6678_v45 }
 0x198   : > { %v6682_v29 = vpop.f32.mrf.mxu0 }
 0x199   : > { %v6680_v56 = vpop.f32.mrf.mxu1  ;;  %7069 = vst [vmem:[#allocation31_spill] sm:$0xff] %v6682_v29 }
 0x19a   : > { %7068 = vst [vmem:[#allocation30_spill] sm:$0xff] %v6680_v56  ;;  %v6686_v25 = vpop.f32.mrf.mxu0 }
 0x19b   : > { %v6684_v24 = vpop.f32.mrf.mxu1  ;;  %7071 = vst [vmem:[#allocation4_spill] sm:$0xff] %v6686_v25 }
 0x19c   : > { %7070 = vst [vmem:[#allocation3_spill] sm:$0xff] %v6684_v24  ;;  %v6690_v21 = vpop.f32.mrf.mxu0 }
 0x19d   : > { %v6688_v2 = vpop.f32.mrf.mxu1  ;;  %7073 = vst [vmem:[#allocation6_spill] sm:$0xff] %v6690_v21 }
 0x19e   : > { %7072 = vst [vmem:[#allocation5_spill] sm:$0xff] %v6688_v2  ;;  %v6694_v38 = vpop.f32.mrf.mxu0 }
 0x19f   : > { %v6692_v42 = vpop.f32.mrf.mxu1  ;;  %7075 = vst [vmem:[#allocation8_spill] sm:$0xff] %v6694_v38 }
 0x1a0   : > { %7074 = vst [vmem:[#allocation7_spill] sm:$0xff] %v6692_v42  ;;  %v6698_v60 = vpop.f32.mrf.mxu0 }
 0x1a1   : > { %v6696_v16 = vpop.f32.mrf.mxu1  ;;  %7077 = vst [vmem:[#allocation9_spill] sm:$0xff] %v6698_v60 }
 0x1a2   : > { %7076 = vst [vmem:[#allocation32_spill] sm:$0xff] %v6696_v16  ;;  %v6702_v56 = vpop.f32.mrf.mxu0 }
 0x1a3   : > { %v6700_v45 = vpop.f32.mrf.mxu1  ;;  %7079 = vst [vmem:[#allocation2_spill] sm:$0xff] %v6702_v56 }
 0x1a4   : > { %7078 = vst [vmem:[#allocation10_spill] sm:$0xff] %v6700_v45  ;;  %v6706_v24 = vpop.f32.mrf.mxu0 }
 0x1a5   : > { %v6704_v29 = vpop.f32.mrf.mxu1  ;;  %7081 = vst [vmem:[#allocation12_spill] sm:$0xff] %v6706_v24 }
 0x1a6   : > { %7080 = vst [vmem:[#allocation11_spill] sm:$0xff] %v6704_v29  ;;  %v6710_v2 = vpop.f32.mrf.mxu0 }
 0x1a7   : > { %v6708_v25 = vpop.f32.mrf.mxu1  ;;  %7083 = vst [vmem:[#allocation14_spill] sm:$0xff] %v6710_v2 }
 0x1a8   : > { %7082 = vst [vmem:[#allocation13_spill] sm:$0xff] %v6708_v25  ;;  %v6714_v38 = vpop.f32.mrf.mxu0  ;;  %v2627_v25 = vadd.f32 %v5091_v58, %v6517_v47  ;;  %v2628_v58 = vadd.f32 %v6620_v40, %v6526_v51 }
 0x1a9   : > { %v6712_v21 = vpop.f32.mrf.mxu1  ;;  %7085 = vst [vmem:[#allocation34_spill] sm:$0xff] %v6714_v38  ;;  %v2626_v38 = vadd.f32 %v2467_v27, %v6520_v43 }
 0x1aa   : > { %7084 = vst [vmem:[#allocation33_spill] sm:$0xff] %v6712_v21  ;;  %v6718_v60 = vpop.f32.mrf.mxu0 }
 0x1ab   : > { %v6716_v16 = vpop.f32.mrf.mxu1  ;;  %7087 = vst [vmem:[#allocation36_spill] sm:$0xff] %v6718_v60  ;;  %v3018_v60 = vadd.f32 %v6610_v54, %v2627_v25  ;;  %v3017_v47 = vadd.f32 %v6614_v18, %v2626_v38  ;;  %v2631_v54 = vadd.f32 %v6624_v10, %v6529_v12  ;;  %v2633_v12 = vadd.f32 %v6632_v22, %v6535_v15 }
 0x1ac   : > { %7086 = vst [vmem:[#allocation35_spill] sm:$0xff] %v6716_v16  ;;  %v6722_v56 = vpop.f32.mrf.mxu0  ;;  %v2632_v10 = vadd.f32 %v6636_v33, %v6538_v37 }
 0x1ad   : > { %v6720_v45 = vpop.f32.mrf.mxu1  ;;  %7088 = vst [vmem:[#allocation37_spill] sm:$0xff] %v6722_v56  ;;  %v2629_v56 = vadd.f32 %v6616_v41, %v6523_v61  ;;  %v3024_v15 = vadd.f32 %v6634_v44, %v2633_v12 }
 0x1ae   : > { %v6726_v24 = vpop.f32.mrf.mxu0  ;;  %v3023_v37 = vadd.f32 %v6638_v26, %v2632_v10 }
 0x1af   : > { %v6724_v29 = vpop.f32.mrf.mxu1  ;;  %7090 = vst [vmem:[#allocation39_spill] sm:$0xff] %v6726_v24  ;;  %v3020_v61 = vadd.f32 %v6618_v28, %v2629_v56  ;;  %v3022_v56 = vadd.f32 %v6626_v13, %v2631_v54 }
 0x1b0   : > { %7089 = vst [vmem:[#allocation38_spill] sm:$0xff] %v6724_v29  ;;  %v6731_v21 = vpop.f32.mrf.mxu0 }
 0x1b1   : > { %v6729_v2 = vpop.f32.mrf.mxu1  ;;  %7091 = vst [vmem:[#allocation40_spill] sm:$0xff] %v6731_v21 }
 0x1b2   : > { %v6736_v16 = vpop.f32.mrf.mxu0 }
 0x1b3   : > { %v6734_v42 = vpop.f32.mrf.mxu1  ;;  %7093 = vst [vmem:[#allocation42_spill] sm:$0xff] %v6736_v16 }
 0x1b4   : > { %7092 = vst [vmem:[#allocation41_spill] sm:$0xff] %v6734_v42  ;;  %v5241_v24 = vpop.f32.mrf.mxu0 }
 0x1b5   : > { %v5191_v29 = vpop.f32.mrf.mxu1 }
 0x1b6   : > { %v3408_v21 = vadd.f32 %v5191_v29, %v3018_v60  ;;  %v3638_v25 = vpop.f32.mrf.mxu0  ;;  %v3019_v60 = vadd.f32 %v6622_v39, %v2628_v58  ;;  %v2630_v29 = vadd.f32 %v6628_v5, %v6532_v20 }
 0x1b7   : > { %v3248_v43 = vpop.f32.mrf.mxu1 }
 0x1b8   : > { %v3798_v38 = vadd.f32 %v5241_v24, %v3408_v21  ;;  %v3407_v27 = vadd.f32 %v3248_v43, %v3017_v47  ;;  %v5244_v51 = vpop.f32.mrf.mxu0  ;;  %v3021_v20 = vadd.f32 %v6630_v31, %v2630_v29 }
 0x1b9   : > { %v5194_v18 = vpop.f32.mrf.mxu1 }
 0x1ba   : > { %3831 = vst.msk [vmem:[%s6748_s20 + $0x8] sm:$0xff] %vm3829_vm2, %v3798_v38  ;;  %v3797_v41 = vadd.f32 %v3638_v25, %v3407_v27  ;;  %v3410_v40 = vadd.f32 %v5194_v18, %v3020_v61  ;;  %v3648_v42 = vpop.f32.mrf.mxu0 }
 0x1bb   : > { %v3258_v16 = vpop.f32.mrf.mxu1 }
 0x1bc   : > { %3830 = vst.msk [vmem:[%s6748_s20] sm:$0xff] %vm3829_vm2, %v3797_v41  ;;  %v3800_v21 = vadd.f32 %v5244_v51, %v3410_v40  ;;  %v3409_v24 = vadd.f32 %v3258_v16, %v3019_v60  ;;  %v5247_v39 = vpop.f32.mrf.mxu0  ;;  %v2635_v16 = vadd.f32 %v6640_v36, %v6541_v62  ;;  %v2637_v36 = vadd.f32 %v6648_v59, %v6547_v11 }
 0x1bd   : > { %v5197_v28 = vpop.f32.mrf.mxu1  ;;  %v2639_v59 = vadd.f32 %v6656_v32, %v6553_v6  ;;  %v2641_v32 = vadd.f32 %v6664_v23, %v6559_v1  ;;  %v2643_v23 = vadd.f32 %v6672_v8, %v6565_v9  ;;  %v7094_v8 = vld [vmem:[#allocation15_spill] sm:$0xff] }
 0x1be   : > { %3833 = vst.msk [vmem:[%s6748_s20 + $0x18] sm:$0xff] %vm3829_vm2, %v3800_v21  ;;  %v3799_v5 = vadd.f32 %v3648_v42, %v3409_v24  ;;  %v3412_v13 = vadd.f32 %v5197_v28, %v3022_v56  ;;  %v3658_v58 = vpop.f32.mrf.mxu0  ;;  %v2634_v42 = vadd.f32 %v6644_v3, %v6544_v57  ;;  %v3026_v62 = vadd.f32 %v6642_v35, %v2635_v16 }
 0x1bf   : > { %v3268_v47 = vpop.f32.mrf.mxu1  ;;  %v2636_v3 = vadd.f32 %v6652_v19, %v6550_v0  ;;  %v3028_v11 = vadd.f32 %v6650_v55, %v2637_v36  ;;  %v2638_v19 = vadd.f32 %v6660_v52, %v6556_v63  ;;  %v3030_v6 = vadd.f32 %v6658_v49, %v2639_v59 }
 0x1c0   : > { %3832 = vst.msk [vmem:[%s6748_s20 + $0x10] sm:$0xff] %vm3829_vm2, %v3799_v5  ;;  %v3802_v22 = vadd.f32 %v5247_v39, %v3412_v13  ;;  %v3411_v31 = vadd.f32 %v3268_v47, %v3021_v20  ;;  %v5250_v25 = vpop.f32.mrf.mxu0  ;;  %v3025_v57 = vadd.f32 %v6646_v7, %v2634_v42  ;;  %v2640_v52 = vadd.f32 %v6668_v48, %v6562_v30 }
 0x1c1   : > { %v5200_v43 = vpop.f32.mrf.mxu1  ;;  %v3027_v0 = vadd.f32 %v6654_v4, %v2636_v3  ;;  %v3029_v63 = vadd.f32 %v6662_v50, %v2638_v19  ;;  %v3032_v1 = vadd.f32 %v6666_v53, %v2641_v32  ;;  %v2642_v48 = vadd.f32 %v6676_v17, %v6568_v34  ;;  %v7097_v17 = vld [vmem:[#allocation16_spill] sm:$0xff] }
 0x1c2   : > { %3835 = vst.msk [vmem:[%s6748_s20 + $0x28] sm:$0xff] %vm3829_vm2, %v3802_v22  ;;  %v3801_v33 = vadd.f32 %v3658_v58, %v3411_v31  ;;  %v3414_v44 = vadd.f32 %v5200_v43, %v3024_v15  ;;  %v3668_v54 = vpop.f32.mrf.mxu0  ;;  %v3031_v30 = vadd.f32 %v6670_v14, %v2640_v52  ;;  %v3034_v9 = vadd.f32 %v6674_v46, %v2643_v23  ;;  %v7095_v43 = vld [vmem:[#allocation30_spill] sm:$0xff] }
 0x1c3   : > { %v3278_v61 = vpop.f32.mrf.mxu1 }
 0x1c4   : > { %3834 = vst.msk [vmem:[%s6748_s20 + $0x20] sm:$0xff] %vm3829_vm2, %v3801_v33  ;;  %v3804_v38 = vadd.f32 %v5250_v25, %v3414_v44  ;;  %v3413_v26 = vadd.f32 %v3278_v61, %v3023_v37  ;;  %v5253_v18 = vpop.f32.mrf.mxu0  ;;  %v2645_v25 = vadd.f32 %v7095_v43, %v7094_v8  ;;  %v7096_v44 = vld [vmem:[#allocation29_spill] sm:$0xff]  ;;  %v7098_v61 = vld [vmem:[#allocation3_spill] sm:$0xff]  ;;  %v7115_v43 = vld [vmem:[#allocation22_spill] sm:$0xff] }
 0x1c5   : > { %v5203_v27 = vpop.f32.mrf.mxu1  ;;  %v3033_v34 = vadd.f32 %v7096_v44, %v2642_v48 }
 0x1c6   : > { %3837 = vst.msk [vmem:[%s6748_s20 + $0x38] sm:$0xff] %vm3829_vm2, %v3804_v38  ;;  %v3803_v51 = vadd.f32 %v3668_v54, %v3413_v26  ;;  %v3416_v35 = vadd.f32 %v5203_v27, %v3026_v62  ;;  %v3678_v29 = vpop.f32.mrf.mxu0  ;;  %v2644_v54 = vadd.f32 %v7098_v61, %v7097_v17  ;;  %v7099_v26 = vld [vmem:[#allocation31_spill] sm:$0xff] }
 0x1c7   : > { %v3288_v60 = vpop.f32.mrf.mxu1  ;;  %v3036_v27 = vadd.f32 %v7099_v26, %v2645_v25  ;;  %v7116_v25 = vld [vmem:[#allocation13_spill] sm:$0xff]  ;;  %v7118_v61 = vld [vmem:[#allocation23_spill] sm:$0xff] }
 0x1c8   : > { %3836 = vst.msk [vmem:[%s6748_s20 + $0x30] sm:$0xff] %vm3829_vm2, %v3803_v51  ;;  %v3806_v41 = vadd.f32 %v5253_v18, %v3416_v35  ;;  %v3415_v7 = vadd.f32 %v3288_v60, %v3025_v57  ;;  %v5256_v56 = vpop.f32.mrf.mxu0  ;;  %v7100_v18 = vld [vmem:[#allocation17_spill] sm:$0xff] }
 0x1c9   : > { %v5206_v40 = vpop.f32.mrf.mxu1  ;;  %v7101_v57 = vld [vmem:[#allocation5_spill] sm:$0xff] }
 0x1ca   : > { %3839 = vst.msk [vmem:[%s6748_s20 + $0x48] sm:$0xff] %vm3829_vm2, %v3806_v41  ;;  %v3805_v12 = vadd.f32 %v3678_v29, %v3415_v7  ;;  %v3418_v55 = vadd.f32 %v5206_v40, %v3028_v11  ;;  %v3688_v24 = vpop.f32.mrf.mxu0  ;;  %v2647_v3 = vadd.f32 %v7101_v57, %v7100_v18  ;;  %v7102_v11 = vld [vmem:[#allocation4_spill] sm:$0xff]  ;;  %v7103_v41 = vld [vmem:[#allocation18_spill] sm:$0xff]  ;;  %v7104_v7 = vld [vmem:[#allocation7_spill] sm:$0xff] }
 0x1cb   : > { %v3298_v21 = vpop.f32.mrf.mxu1  ;;  %v3035_v59 = vadd.f32 %v7102_v11, %v2644_v54  ;;  %v2646_v40 = vadd.f32 %v7104_v7, %v7103_v41  ;;  %v7119_v54 = vld [vmem:[#allocation33_spill] sm:$0xff]  ;;  %v7121_v57 = vld [vmem:[#allocation24_spill] sm:$0xff] }
 0x1cc   : > { %3838 = vst.msk [vmem:[%s6748_s20 + $0x40] sm:$0xff] %vm3829_vm2, %v3805_v12  ;;  %v3808_v28 = vadd.f32 %v5256_v56, %v3418_v55  ;;  %v3417_v4 = vadd.f32 %v3298_v21, %v3027_v0  ;;  %v5259_v20 = vpop.f32.mrf.mxu0  ;;  %v7105_v55 = vld [vmem:[#allocation6_spill] sm:$0xff]  ;;  %v7124_v7 = vld [vmem:[#allocation25_spill] sm:$0xff] }
 0x1cd   : > { %v5209_v39 = vpop.f32.mrf.mxu1  ;;  %v3038_v21 = vadd.f32 %v7105_v55, %v2647_v3  ;;  %v7122_v3 = vld [vmem:[#allocation35_spill] sm:$0xff]  ;;  %v7125_v55 = vld [vmem:[#allocation36_spill] sm:$0xff] }
 0x1ce   : > { %3841 = vst.msk [vmem:[%s6748_s20 + $0x58] sm:$0xff] %vm3829_vm2, %v3808_v28  ;;  %v3807_v10 = vadd.f32 %v3688_v24, %v3417_v4  ;;  %v3420_v49 = vadd.f32 %v5209_v39, %v3030_v6  ;;  %v3698_v13 = vpop.f32.mrf.mxu0  ;;  %v7106_v24 = vld [vmem:[#allocation19_spill] sm:$0xff]  ;;  %v7107_v6 = vld [vmem:[#allocation32_spill] sm:$0xff] }
 0x1cf   : > { %v3308_v5 = vpop.f32.mrf.mxu1  ;;  %v2649_v32 = vadd.f32 %v7107_v6, %v7106_v24  ;;  %v7126_v24 = vld [vmem:[#allocation26_spill] sm:$0xff] }
 0x1d0   : > { %3840 = vst.msk [vmem:[%s6748_s20 + $0x50] sm:$0xff] %vm3829_vm2, %v3807_v10  ;;  %v3810_v47 = vadd.f32 %v5259_v20, %v3420_v49  ;;  %v3419_v50 = vadd.f32 %v3308_v5, %v3029_v63  ;;  %v5262_v15 = vpop.f32.mrf.mxu0  ;;  %v7108_v63 = vld [vmem:[#allocation8_spill] sm:$0xff]  ;;  %v7110_v49 = vld [vmem:[#allocation10_spill] sm:$0xff] }
 0x1d1   : > { %v5212_v58 = vpop.f32.mrf.mxu1  ;;  %v3037_v52 = vadd.f32 %v7108_v63, %v2646_v40  ;;  %v7109_v10 = vld [vmem:[#allocation20_spill] sm:$0xff]  ;;  %v2655_v40 = vadd.f32 %v6720_v45, %v7124_v7  ;;  %v7127_v6 = vld [vmem:[#allocation38_spill] sm:$0xff]  ;;  %v7128_v63 = vld [vmem:[#allocation37_spill] sm:$0xff] }
 0x1d2   : > { %3843 = vst.msk [vmem:[%s6748_s20 + $0x68] sm:$0xff] %vm3829_vm2, %v3810_v47  ;;  %v3809_v16 = vadd.f32 %v3698_v13, %v3419_v50  ;;  %v3422_v53 = vadd.f32 %v5212_v58, %v3032_v1  ;;  %v3708_v31 = vpop.f32.mrf.mxu0  ;;  %v2648_v5 = vadd.f32 %v7110_v49, %v7109_v10  ;;  %v7111_v50 = vld [vmem:[#allocation9_spill] sm:$0xff] }
 0x1d3   : > { %v3318_v22 = vpop.f32.mrf.mxu1  ;;  %v3040_v58 = vadd.f32 %v7111_v50, %v2649_v32  ;;  %v2654_v32 = vadd.f32 %v7127_v6, %v7126_v24  ;;  %v3046_v45 = vadd.f32 %v7128_v63, %v2655_v40  ;;  %v7131_v50 = vld [vmem:[#allocation28_spill] sm:$0xff] }
 0x1d4   : > { %3842 = vst.msk [vmem:[%s6748_s20 + $0x60] sm:$0xff] %vm3829_vm2, %v3809_v16  ;;  %v3812_v37 = vadd.f32 %v5262_v15, %v3422_v53  ;;  %v3421_v14 = vadd.f32 %v3318_v22, %v3031_v30  ;;  %v5265_v33 = vpop.f32.mrf.mxu0  ;;  %v7112_v15 = vld [vmem:[#allocation21_spill] sm:$0xff]  ;;  %v7113_v30 = vld [vmem:[#allocation11_spill] sm:$0xff] }
 0x1d5   : > { %v5215_v42 = vpop.f32.mrf.mxu1  ;;  %v2651_v48 = vadd.f32 %v7113_v30, %v7112_v15 }
 0x1d6   : > { %3845 = vst.msk [vmem:[%s6748_s20 + $0x78] sm:$0xff] %vm3829_vm2, %v3812_v37  ;;  %v3811_v62 = vadd.f32 %v3708_v31, %v3421_v14  ;;  %v3424_v46 = vadd.f32 %v5215_v42, %v3034_v9  ;;  %v3718_v38 = vpop.f32.mrf.mxu0  ;;  %v7114_v9 = vld [vmem:[#allocation2_spill] sm:$0xff]  ;;  %v2650_v37 = vadd.f32 %v7116_v25, %v7115_v43 }
 0x1d7   : > { %v3328_v36 = vpop.f32.mrf.mxu1  ;;  %v3039_v8 = vadd.f32 %v7114_v9, %v2648_v5  ;;  %v7134_v25 = vld [vmem:[#allocation42_spill] sm:$0xff] }
 0x1d8   : > { %3844 = vst.msk [vmem:[%s6748_s20 + $0x70] sm:$0xff] %vm3829_vm2, %v3811_v62  ;;  %v3814_v51 = vadd.f32 %v5265_v33, %v3424_v46  ;;  %v3423_v35 = vadd.f32 %v3328_v36, %v3033_v34  ;;  %v5268_v29 = vpop.f32.mrf.mxu0  ;;  %v7117_v34 = vld [vmem:[#allocation12_spill] sm:$0xff]  ;;  %v2653_v62 = vadd.f32 %v7119_v54, %v7118_v61 }
 0x1d9   : > { %v5218_v60 = vpop.f32.mrf.mxu1  ;;  %v3042_v17 = vadd.f32 %v7117_v34, %v2651_v48 }
 0x1da   : > { %3847 = vst.msk [vmem:[%s6748_s20 + $0x88] sm:$0xff] %vm3829_vm2, %v3814_v51  ;;  %v3813_v56 = vadd.f32 %v3718_v38, %v3423_v35  ;;  %v3426_v0 = vadd.f32 %v5218_v60, %v3036_v27  ;;  %v3728_v12 = vpop.f32.mrf.mxu0  ;;  %v7120_v27 = vld [vmem:[#allocation14_spill] sm:$0xff]  ;;  %v2652_v51 = vadd.f32 %v7122_v3, %v7121_v57 }
 0x1db   : > { %v3338_v19 = vpop.f32.mrf.mxu1  ;;  %v3041_v18 = vadd.f32 %v7120_v27, %v2650_v37 }
 0x1dc   : > { %3846 = vst.msk [vmem:[%s6748_s20 + $0x80] sm:$0xff] %vm3829_vm2, %v3813_v56  ;;  %v3816_v28 = vadd.f32 %v5268_v29, %v3426_v0  ;;  %v3425_v4 = vadd.f32 %v3338_v19, %v3035_v59  ;;  %v5271_v20 = vpop.f32.mrf.mxu0  ;;  %v7123_v59 = vld [vmem:[#allocation34_spill] sm:$0xff] }
 0x1dd   : > { %v5221_v39 = vpop.f32.mrf.mxu1  ;;  %v3044_v41 = vadd.f32 %v7123_v59, %v2653_v62 }
 0x1de   : > { %3849 = vst.msk [vmem:[%s6748_s20 + $0x98] sm:$0xff] %vm3829_vm2, %v3816_v28  ;;  %v3815_v13 = vadd.f32 %v3728_v12, %v3425_v4  ;;  %v3428_v1 = vadd.f32 %v5221_v39, %v3038_v21  ;;  %v3738_v47 = vpop.f32.mrf.mxu0  ;;  %v3043_v21 = vadd.f32 %v7125_v55, %v2652_v51 }
 0x1df   : > { %v3348_v23 = vpop.f32.mrf.mxu1 }
 0x1e0   : > { %3848 = vst.msk [vmem:[%s6748_s20 + $0x90] sm:$0xff] %vm3829_vm2, %v3815_v13  ;;  %v3818_v16 = vadd.f32 %v5271_v20, %v3428_v1  ;;  %v3427_v53 = vadd.f32 %v3348_v23, %v3037_v52  ;;  %v5274_v31 = vpop.f32.mrf.mxu0  ;;  %v7129_v52 = vld [vmem:[#allocation27_spill] sm:$0xff] }
 0x1e1   : > { %v5224_v22 = vpop.f32.mrf.mxu1  ;;  %v2657_v10 = vadd.f32 %v6729_v2, %v7129_v52  ;;  %v7130_v23 = vld [vmem:[#allocation39_spill] sm:$0xff]  ;;  %v7133_v2 = vld [vmem:[#allocation40_spill] sm:$0xff] }
 0x1e2   : > { %3851 = vst.msk [vmem:[%s6748_s20 + $0xa8] sm:$0xff] %vm3829_vm2, %v3818_v16  ;;  %v3817_v14 = vadd.f32 %v3738_v47, %v3427_v53  ;;  %v3430_v42 = vadd.f32 %v5224_v22, %v3040_v58  ;;  %v3748_v44 = vpop.f32.mrf.mxu0  ;;  %v3045_v47 = vadd.f32 %v7130_v23, %v2654_v32  ;;  %v7132_v58 = vld [vmem:[#allocation41_spill] sm:$0xff] }
 0x1e3   : > { %v3358_v33 = vpop.f32.mrf.mxu1  ;;  %v2656_v15 = vadd.f32 %v7132_v58, %v7131_v50  ;;  %v3048_v22 = vadd.f32 %v7133_v2, %v2657_v10 }
 0x1e4   : > { %3850 = vst.msk [vmem:[%s6748_s20 + $0xa0] sm:$0xff] %vm3829_vm2, %v3817_v14  ;;  %v3820_v46 = vadd.f32 %v5274_v31, %v3430_v42  ;;  %v3429_v36 = vadd.f32 %v3358_v33, %v3039_v8  ;;  %v5277_v26 = vpop.f32.mrf.mxu0 }
 0x1e5   : > { %v5227_v38 = vpop.f32.mrf.mxu1  ;;  %v3047_v37 = vadd.f32 %v7134_v25, %v2656_v15 }
 0x1e6   : > { %3853 = vst.msk [vmem:[%s6748_s20 + $0xb8] sm:$0xff] %vm3829_vm2, %v3820_v46  ;;  %v3819_v35 = vadd.f32 %v3748_v44, %v3429_v36  ;;  %v3432_v60 = vadd.f32 %v5227_v38, %v3042_v17  ;;  %v3758_v11 = vpop.f32.mrf.mxu0 }
 0x1e7   : > { %v3368_v29 = vpop.f32.mrf.mxu1 }
 0x1e8   : > { %3852 = vst.msk [vmem:[%s6748_s20 + $0xb0] sm:$0xff] %vm3829_vm2, %v3819_v35  ;;  %v3822_v56 = vadd.f32 %v5277_v26, %v3432_v60  ;;  %v3431_v0 = vadd.f32 %v3368_v29, %v3041_v18  ;;  %v5280_v12 = vpop.f32.mrf.mxu0 }
 0x1e9   : > { %v5230_v19 = vpop.f32.mrf.mxu1 }
 0x1ea   : > { %3855 = vst.msk [vmem:[%s6748_s20 + $0xc8] sm:$0xff] %vm3829_vm2, %v3822_v56  ;;  %v3821_v28 = vadd.f32 %v3758_v11, %v3431_v0  ;;  %v3434_v4 = vadd.f32 %v5230_v19, %v3044_v41  ;;  %v3768_v20 = vpop.f32.mrf.mxu0 }
 0x1eb   : > { %v3378_v39 = vpop.f32.mrf.mxu1 }
 0x1ec   : > { %3854 = vst.msk [vmem:[%s6748_s20 + $0xc0] sm:$0xff] %vm3829_vm2, %v3821_v28  ;;  %v3824_v49 = vadd.f32 %v5280_v12, %v3434_v4  ;;  %v3433_v5 = vadd.f32 %v3378_v39, %v3043_v21  ;;  %v5283_v1 = vpop.f32.mrf.mxu0 }
 0x1ed   : > { %v5233_v13 = vpop.f32.mrf.mxu1 }
 0x1ee   : > { %3857 = vst.msk [vmem:[%s6748_s20 + $0xd8] sm:$0xff] %vm3829_vm2, %v3824_v49  ;;  %v3823_v30 = vadd.f32 %v3768_v20, %v3433_v5  ;;  %v3436_v48 = vadd.f32 %v5233_v13, %v3046_v45  ;;  %v3778_v53 = vpop.f32.mrf.mxu0 }
 0x1ef   : > { %v3388_v16 = vpop.f32.mrf.mxu1 }
 0x1f0   : > { %3856 = vst.msk [vmem:[%s6748_s20 + $0xd0] sm:$0xff] %vm3829_vm2, %v3823_v30  ;;  %v3826_v31 = vadd.f32 %v5283_v1, %v3436_v48  ;;  %v3435_v9 = vadd.f32 %v3388_v16, %v3045_v47  ;;  %v5286_v43 = vpop.f32.mrf.mxu0 }
 0x1f1   : > { %v5236_v8 = vpop.f32.mrf.mxu1 }
 0x1f2   : > { %3859 = vst.msk [vmem:[%s6748_s20 + $0xe8] sm:$0xff] %vm3829_vm2, %v3826_v31  ;;  %v3825_v14 = vadd.f32 %v3778_v53, %v3435_v9  ;;  %v3438_v42 = vadd.f32 %v5236_v8, %v3048_v22  ;;  %v3788_v17 = vpop.f32.mrf.mxu0 }
 0x1f3   : > { %v3398_v33 = vpop.f32.mrf.mxu1 }
 0x1f4   : > { %3858 = vst.msk [vmem:[%s6748_s20 + $0xe0] sm:$0xff] %vm3829_vm2, %v3825_v14  ;;  %v3828_v44 = vadd.f32 %v5286_v43, %v3438_v42  ;;  %v3437_v34 = vadd.f32 %v3398_v33, %v3047_v37 }
 0x1f6   : > { %3861 = vst.msk [vmem:[%s6748_s20 + $0xf8] sm:$0xff] %vm3829_vm2, %v3828_v44  ;;  %v3827_v61 = vadd.f32 %v3788_v17, %v3437_v34 }
 0x1f8   : > { %3860 = vst.msk [vmem:[%s6748_s20 + $0xf0] sm:$0xff] %vm3829_vm2, %v3827_v61 }
 0x1f9 PF: > { %s13_s14 = sadd.s32 1, %s5336_s14   ;;  %s7135_s12 = smov %s5332_s13 }
 0x1fa   : > { %p10_p5 = scmp.ge.s32.totalorder %s13_s14, 4   ;;  %s7136_s13 = smov %s7138_s15 }
 0x1fc   :  { %12 = sbr.rel (!%p10_p5) target bundleno = 2 (0x2), region = 78 }

</bundles_post_ra>
